<compile_context>
chip_gen: v6e
topology: v6e:2x2x1
jax: 0.10.0
libtpu: 0.0.40
codegen_flags: <defaults>
</compile_context>

<pallas_src>
import math
import numpy as np
import jax
import jax.numpy as jnp
from jax.experimental import pallas as pl
from jax.experimental.pallas import tpu as pltpu

LSTM_HIDDEN = 200
D_FEAT = LSTM_HIDDEN * 2      # 400: per-sample feature dim of x and of y
D_IN = LSTM_HIDDEN * 4        # 800: F_func input dim (cat of x and y)
H = LSTM_HIDDEN * 2           # 400: F_func hidden dim
N = 8                         # sample_size (small demo batch)


def _softplus(z):
    # torch.nn.Softplus(beta=1, threshold=20)
    return jnp.where(z > 20.0, z, jnp.log1p(jnp.exp(jnp.minimum(z, 20.0))))


def club_nce_kernel(xy_ref, w1_ref, b1_ref, w2c_ref, b2_ref, gsum_ref, diag_ref,
                    lower_ref, upper_ref):
    n = xy_ref.shape[0] // 2          # static
    nn = n * n
    inv_n = 1.0 / n
    log_n = math.log(n)

    xy = xy_ref[...]          # (2N, 800): rows 0..N-1 = [x_j | 0], N..2N-1 = [0 | y_i]
    w1 = w1_ref[...]          # (800, 400)
    b1 = b1_ref[...]          # (1, 400)
    w2c = w2c_ref[...]        # (400, 1)   second Linear weight as a column
    b2 = b2_ref[...]          # (1, 1)
    gsum = gsum_ref[...]      # (N, N*N)   gsum[i, i*N + j] = 1
    diag = diag_ref[...]      # (N*N, 1)   diag[i*N + i, 0] = 1

    # Single fused K=800 projection on the MXU:
    #   proj[:N] = x @ W1x,  proj[N:] = y @ W1y   (cat(x,y)@W1 == x@W1x + y@W1y)
    proj = jnp.dot(xy, w1, preferred_element_type=jnp.float32)        # (2N, H)
    xa = proj[:n]                                                     # (N, H)
    yb = proj[n:]                                                     # (N, H)

    # All-pairs hidden layer: h1[i, j, :] = relu(x[j]@W1x + y[i]@W1y + b1).
    h1 = jnp.maximum(yb[:, None, :] + xa[None, :, :] + b1[None, :, :], 0.0)  # (N,N,H)
    h1f = h1.reshape(nn, h1.shape[-1])            # (N*N, H): free leading-dim merge

    # Second Linear as an MXU matvec, then Softplus.  Row r = i*N + j.
    z1 = jnp.dot(h1f, w2c, preferred_element_type=jnp.float32) + b2   # (N*N, 1)
    t1 = _softplus(z1)                                                # (N*N, 1)

    # logsumexp over j: global max shift (mathematically identical to per-row),
    # per-row sums of exp() via a constant indicator matvec on the MXU.
    m = jnp.max(t1, axis=0, keepdims=True)                            # (1, 1)
    e = jnp.exp(t1 - m)                                               # (N*N, 1)
    row_sum = jnp.dot(gsum, e, preferred_element_type=jnp.float32)    # (N, 1)
    lse = m + jnp.log(row_sum)                                        # (N, 1)

    # Fused scalar reductions (T0 is the diagonal of T1).
    t0_sum = jnp.sum(diag * t1, axis=0, keepdims=True)                # (1, 1)
    t1_sum = jnp.sum(t1, axis=0, keepdims=True)                       # (1, 1)
    lse_sum = jnp.sum(lse, axis=0, keepdims=True)                     # (1, 1)

    t0_mean = t0_sum * inv_n
    lower_ref[...] = t0_mean - (lse_sum * inv_n - log_n)
    upper_ref[...] = t0_mean - t1_sum * (inv_n * inv_n)


@jax.jit
def club_nce_forward(x_samples, y_samples, W1, b1_row, w2_row, b2):
    """Returns (lower_bound, upper_bound) exactly as the PyTorch module.

    Layout contract: W1 is (in=800, out=400), i.e. transposed vs. torch's
    Linear.weight; b1_row is (1, 400), w2_row is (1, 400), b2 is (1, 1).
    """
    n, d = x_samples.shape
    assert y_samples.shape == (n, d)
    assert W1.shape == (2 * d, b1_row.shape[1])
    assert b1_row.shape[0] == 1 and w2_row.shape == b1_row.shape
    assert b2.shape == (1, 1)

    f32 = jnp.float32
    zeros = jnp.zeros((n, d), f32)
    # Block-stacked input so a single K=2d matmul yields both half-projections.
    xy = jnp.concatenate(
        [jnp.concatenate([x_samples, zeros], axis=1),
         jnp.concatenate([zeros, y_samples], axis=1)], axis=0)        # (2n, 2d)

    w2_col = jnp.transpose(w2_row)                                    # (H, 1)

    # Constant indicator matrices for the fused in-kernel reductions
    # (constant-folded by XLA under jit).
    r = jnp.arange(n * n, dtype=jnp.int32)
    gsum = (r[None, :] // n ==
            jnp.arange(n, dtype=jnp.int32)[:, None]).astype(f32)      # (n, n*n)
    diag = ((r % n) == (r // n)).astype(f32).reshape(n * n, 1)        # (n*n, 1)

    vmem = pl.BlockSpec(memory_space=pltpu.MemorySpace.VMEM)
    lower, upper = pl.pallas_call(
        club_nce_kernel,
        out_shape=(jax.ShapeDtypeStruct((1, 1), f32),   # lower_bound
                   jax.ShapeDtypeStruct((1, 1), f32)),  # upper_bound
        in_specs=[vmem] * 7,
        out_specs=(vmem, vmem),
    )(xy, W1, b1_row, w2_col, b2, gsum, diag)
    return lower[0, 0], upper[0, 0]


def club_nce_reference(x_samples, y_samples, W1, b1_row, w2_row, b2):
    """Pure-JAX replica of the PyTorch forward, for a correctness check."""
    n = y_samples.shape[0]

    def F(inp):  # inp: (..., 800)
        h = jnp.maximum(inp @ W1 + b1_row[0], 0.0)
        z = h @ w2_row[0] + b2[0, 0]
        return _softplus(z)

    T0 = F(jnp.concatenate([x_samples, y_samples], axis=-1))           # (N,)
    x_tile = jnp.broadcast_to(x_samples[None, :, :], (n, n, x_samples.shape[1]))
    y_tile = jnp.broadcast_to(y_samples[:, None, :], (n, n, y_samples.shape[1]))
    T1 = F(jnp.concatenate([x_tile, y_tile], axis=-1))                 # (N, N)
    lower = T0.mean() - (jax.scipy.special.logsumexp(T1, axis=1).mean()
                         - jnp.log(jnp.float32(n)))
    upper = T0.mean() - T1.mean()
    return lower, upper


if __name__ == "__main__":
    key = jax.random.PRNGKey(0)
    k_w1, k_b1, k_w2, k_b2, k_x, k_y = jax.random.split(key, 6)

    # Deterministic synthetic parameters (torch nn.Linear-style uniform init).
    lim1 = 1.0 / np.sqrt(D_IN)
    W1 = jax.random.uniform(k_w1, (D_IN, H), jnp.float32, -lim1, lim1)
    b1_row = jax.random.uniform(k_b1, (1, H), jnp.float32, -lim1, lim1)
    lim2 = 1.0 / np.sqrt(H)
    w2_row = jax.random.uniform(k_w2, (1, H), jnp.float32, -lim2, lim2)
    b2 = jax.random.uniform(k_b2, (1, 1), jnp.float32, -lim2, lim2)

    # Deterministic inputs.
    x_samples = jax.random.normal(k_x, (N, D_FEAT), jnp.float32)
    y_samples = jax.random.normal(k_y, (N, D_FEAT), jnp.float32)

    lower, upper = jax.block_until_ready(
        club_nce_forward(x_samples, y_samples, W1, b1_row, w2_row, b2))

    ref_lower, ref_upper = jax.block_until_ready(
        club_nce_reference(x_samples, y_samples, W1, b1_row, w2_row, b2))

    np.testing.assert_allclose(np.asarray(lower), np.asarray(ref_lower),
                               rtol=1e-4, atol=1e-4)
    np.testing.assert_allclose(np.asarray(upper), np.asarray(ref_upper),
                               rtol=1e-4, atol=1e-4)

    print("KERNEL_OK")
</pallas_src>

<mosaic_0001>
module attributes {stable_mosaic.version = 11 : i64} {
  func.func @club_nce_kernel(%arg0: memref<16x800xf32, #tpu.memory_space<vmem>>, %arg1: memref<800x400xf32, #tpu.memory_space<vmem>>, %arg2: memref<1x400xf32, #tpu.memory_space<vmem>>, %arg3: memref<400x1xf32, #tpu.memory_space<vmem>>, %arg4: memref<1x1xf32, #tpu.memory_space<vmem>>, %arg5: memref<8x64xf32, #tpu.memory_space<vmem>>, %arg6: memref<64x1xf32, #tpu.memory_space<vmem>>, %arg7: memref<1x1xf32, #tpu.memory_space<vmem>>, %arg8: memref<1x1xf32, #tpu.memory_space<vmem>>) attributes {dimension_semantics = [], scalar_prefetch = 0 : i64, scratch_operands = 0 : i64, tpu.core_type = #tpu.core_type<tc>} {
    %c0 = arith.constant 0 : index
    %c0_0 = arith.constant 0 : index
    %0 = vector.load %arg0[%c0, %c0_0] : memref<16x800xf32, #tpu.memory_space<vmem>>, vector<16x800xf32>
    %c0_1 = arith.constant 0 : index
    %c0_2 = arith.constant 0 : index
    %1 = vector.load %arg1[%c0_1, %c0_2] : memref<800x400xf32, #tpu.memory_space<vmem>>, vector<800x400xf32>
    %c0_3 = arith.constant 0 : index
    %c0_4 = arith.constant 0 : index
    %2 = vector.load %arg2[%c0_3, %c0_4] : memref<1x400xf32, #tpu.memory_space<vmem>>, vector<1x400xf32>
    %c0_5 = arith.constant 0 : index
    %c0_6 = arith.constant 0 : index
    %3 = vector.load %arg3[%c0_5, %c0_6] : memref<400x1xf32, #tpu.memory_space<vmem>>, vector<400x1xf32>
    %c0_7 = arith.constant 0 : index
    %c0_8 = arith.constant 0 : index
    %4 = vector.load %arg4[%c0_7, %c0_8] : memref<1x1xf32, #tpu.memory_space<vmem>>, vector<1x1xf32>
    %c0_9 = arith.constant 0 : index
    %c0_10 = arith.constant 0 : index
    %5 = vector.load %arg5[%c0_9, %c0_10] : memref<8x64xf32, #tpu.memory_space<vmem>>, vector<8x64xf32>
    %c0_11 = arith.constant 0 : index
    %c0_12 = arith.constant 0 : index
    %6 = vector.load %arg6[%c0_11, %c0_12] : memref<64x1xf32, #tpu.memory_space<vmem>>, vector<64x1xf32>
    %cst = arith.constant dense<0.000000e+00> : vector<16x400xf32>
    %7 = tpu.matmul %0, %1, %cst {dimension_numbers = #tpu.dot_dimension_numbers<[1], [0], [0], [1], [0, 0, 1, 1], [], []>} : vector<16x800xf32>, vector<800x400xf32>, vector<16x400xf32> -> vector<16x400xf32>
    %8 = vector.extract_strided_slice %7 {offsets = [0, 0], sizes = [8, 400], strides = [1, 1]} : vector<16x400xf32> to vector<8x400xf32>
    %9 = vector.extract_strided_slice %7 {offsets = [8, 0], sizes = [8, 400], strides = [1, 1]} : vector<16x400xf32> to vector<8x400xf32>
    %10 = vector.shape_cast %9 : vector<8x400xf32> to vector<8x1x400xf32>
    %11 = vector.shape_cast %8 : vector<8x400xf32> to vector<1x8x400xf32>
    %12 = vector.broadcast %10 : vector<8x1x400xf32> to vector<8x8x400xf32>
    %13 = vector.broadcast %11 : vector<1x8x400xf32> to vector<8x8x400xf32>
    %14 = arith.addf %12, %13 : vector<8x8x400xf32>
    %15 = vector.shape_cast %2 : vector<1x400xf32> to vector<1x1x400xf32>
    %16 = vector.broadcast %15 : vector<1x1x400xf32> to vector<8x8x400xf32>
    %17 = arith.addf %14, %16 : vector<8x8x400xf32>
    %cst_13 = arith.constant 0.000000e+00 : f32
    %18 = vector.broadcast %cst_13 : f32 to vector<8x8x400xf32>
    %19 = arith.maximumf %17, %18 : vector<8x8x400xf32>
    %20 = vector.shape_cast %19 : vector<8x8x400xf32> to vector<64x400xf32>
    %cst_14 = arith.constant dense<0.000000e+00> : vector<64x1xf32>
    %21 = tpu.matmul %20, %3, %cst_14 {dimension_numbers = #tpu.dot_dimension_numbers<[1], [0], [0], [1], [0, 0, 1, 1], [], []>} : vector<64x400xf32>, vector<400x1xf32>, vector<64x1xf32> -> vector<64x1xf32>
    %22 = vector.broadcast %4 : vector<1x1xf32> to vector<64x1xf32>
    %23 = arith.addf %21, %22 : vector<64x1xf32>
    %cst_15 = arith.constant 2.000000e+01 : f32
    %24 = vector.broadcast %cst_15 : f32 to vector<64x1xf32>
    %25 = arith.cmpf ogt, %23, %24 : vector<64x1xf32>
    %cst_16 = arith.constant 2.000000e+01 : f32
    %26 = vector.broadcast %cst_16 : f32 to vector<64x1xf32>
    %27 = arith.minimumf %23, %26 : vector<64x1xf32>
    %28 = math.exp %27 : vector<64x1xf32>
    %29 = math.log1p %28 : vector<64x1xf32>
    %30 = arith.select %25, %23, %29 : vector<64x1xi1>, vector<64x1xf32>
    %cst_17 = arith.constant dense<0xFF800000> : vector<1xf32>
    %31 = vector.multi_reduction <maximumf>, %30, %cst_17 [0] : vector<64x1xf32> to vector<1xf32>
    %32 = vector.shape_cast %31 : vector<1xf32> to vector<1x1xf32>
    %33 = vector.broadcast %32 : vector<1x1xf32> to vector<64x1xf32>
    %34 = arith.subf %30, %33 : vector<64x1xf32>
    %35 = math.exp %34 : vector<64x1xf32>
    %cst_18 = arith.constant dense<0.000000e+00> : vector<8x1xf32>
    %36 = tpu.matmul %5, %35, %cst_18 {dimension_numbers = #tpu.dot_dimension_numbers<[1], [0], [0], [1], [0, 0, 1, 1], [], []>} : vector<8x64xf32>, vector<64x1xf32>, vector<8x1xf32> -> vector<8x1xf32>
    %37 = math.log %36 : vector<8x1xf32>
    %38 = vector.broadcast %32 : vector<1x1xf32> to vector<8x1xf32>
    %39 = arith.addf %38, %37 : vector<8x1xf32>
    %40 = arith.mulf %6, %30 : vector<64x1xf32>
    %cst_19 = arith.constant dense<0.000000e+00> : vector<1xf32>
    %41 = vector.multi_reduction <add>, %40, %cst_19 [0] : vector<64x1xf32> to vector<1xf32>
    %42 = vector.shape_cast %41 : vector<1xf32> to vector<1x1xf32>
    %cst_20 = arith.constant dense<0.000000e+00> : vector<1xf32>
    %43 = vector.multi_reduction <add>, %30, %cst_20 [0] : vector<64x1xf32> to vector<1xf32>
    %44 = vector.shape_cast %43 : vector<1xf32> to vector<1x1xf32>
    %cst_21 = arith.constant dense<0.000000e+00> : vector<1xf32>
    %45 = vector.multi_reduction <add>, %39, %cst_21 [0] : vector<8x1xf32> to vector<1xf32>
    %46 = vector.shape_cast %45 : vector<1xf32> to vector<1x1xf32>
    %cst_22 = arith.constant 1.250000e-01 : f32
    %47 = vector.broadcast %cst_22 : f32 to vector<1x1xf32>
    %48 = arith.mulf %42, %47 : vector<1x1xf32>
    %cst_23 = arith.constant 1.250000e-01 : f32
    %49 = vector.broadcast %cst_23 : f32 to vector<1x1xf32>
    %50 = arith.mulf %46, %49 : vector<1x1xf32>
    %cst_24 = arith.constant 2.07944155 : f32
    %51 = vector.broadcast %cst_24 : f32 to vector<1x1xf32>
    %52 = arith.subf %50, %51 : vector<1x1xf32>
    %53 = arith.subf %48, %52 : vector<1x1xf32>
    %c0_25 = arith.constant 0 : index
    %c0_26 = arith.constant 0 : index
    %54 = vector.load %arg7[%c0_25, %c0_26] : memref<1x1xf32, #tpu.memory_space<vmem>>, vector<1x1xf32>
    tpu.vector_store %arg7[%c0_25, %c0_26], %53 {strides = array<i32>} : memref<1x1xf32, #tpu.memory_space<vmem>>, vector<1x1xf32>,
    %cst_27 = arith.constant 1.562500e-02 : f32
    %55 = vector.broadcast %cst_27 : f32 to vector<1x1xf32>
    %56 = arith.mulf %44, %55 : vector<1x1xf32>
    %57 = arith.subf %48, %56 : vector<1x1xf32>
    %c0_28 = arith.constant 0 : index
    %c0_29 = arith.constant 0 : index
    %58 = vector.load %arg8[%c0_28, %c0_29] : memref<1x1xf32, #tpu.memory_space<vmem>>, vector<1x1xf32>
    tpu.vector_store %arg8[%c0_28, %c0_29], %57 {strides = array<i32>} : memref<1x1xf32, #tpu.memory_space<vmem>>, vector<1x1xf32>,
    return
  }
}

</mosaic_0001>

<bundles_post_ra>
// kernel: club_nce_forward.1
= control target key start
LH: loop header
LB: loop body
LE: loop exit
PB: predicated region body
PF: predicated region fallthrough
CT: control target
= control target key end

     0   :  { %s4177_s0 = inlined_call_operand.vmem [shape: f32[16,800], index: 0, kind: input, shape index: {}]   ;;  %s4178_s1 = inlined_call_operand.vmem [shape: f32[800,400], index: 1, kind: input, shape index: {}]   ;;  %s4179_s2 = inlined_call_operand.vmem [shape: f32[1,400], index: 2, kind: input, shape index: {}]   ;;  %s4180_s3 = inlined_call_operand.vmem [shape: f32[400,1], index: 3, kind: input, shape index: {}]   ;;  %s4181_s4 = inlined_call_operand.<no memory space> [shape: f32[1,1], index: 4, kind: input, shape index: {}]   ;;  %s4182_s5 = inlined_call_operand.vmem [shape: f32[8,64], index: 5, kind: input, shape index: {}]   ;;  %s4183_s6 = inlined_call_operand.vmem [shape: f32[64,1], index: 6, kind: input, shape index: {}]   ;;  %s4184_s7 = inlined_call_operand.hbm [shape: f32[1,1], index: 7, kind: output, shape index: {0}]   ;;  %s4185_s8 = inlined_call_operand.hbm [shape: f32[1,1], index: 8, kind: output, shape index: {1}]  }
   0x1   :  { %v14_v0 = vstv %s4181_s4 }
   0x2   :  { %15 = vst [vmem:[#allocation2] sm:$0x1] %v14_v0 }
   0x3   :  { %16 = vsyncpa [#allocation4], 0  ;;  %v107_v1 = vld [vmem:[%s4178_s1 + $0x1e8] sm:$0xff]  ;;  %v106_v3 = vld [vmem:[%s4178_s1 + $0x1e0] sm:$0xff]  ;;  %vm507_vm0 = vcmask 261120  }
   0x4   :  { %v235_v2 = vld [vmem:[%s4178_s1 + $0x5e8] sm:$0xff]  ;;  %514 = vmatprep.subr.mxu0 %v107_v1  ;;  %v234_v4 = vld [vmem:[%s4178_s1 + $0x5e0] sm:$0xff] }
   0x5   :  { %591 = vmatprep.subr.mxu1 %v235_v2  ;;  %v103_v5 = vld [vmem:[%s4178_s1 + $0x1c8] sm:$0xff]  ;;  %515 = vmatpush1.msra.mxu0 %v106_v3  ;;  %v102_v7 = vld [vmem:[%s4178_s1 + $0x1c0] sm:$0xff] }
   0x6   :  { %v231_v6 = vld [vmem:[%s4178_s1 + $0x5c8] sm:$0xff]  ;;  %592 = vmatpush1.msra.mxu1 %v234_v4  ;;  %v230_v8 = vld [vmem:[%s4178_s1 + $0x5c0] sm:$0xff]  ;;  %516 = vmatprep.subr.mxu0 %v103_v5 }
   0x7   :  { %v99_v9 = vld [vmem:[%s4178_s1 + $0x1a8] sm:$0xff]  ;;  %593 = vmatprep.subr.mxu1 %v231_v6  ;;  %v98_v11 = vld [vmem:[%s4178_s1 + $0x1a0] sm:$0xff]  ;;  %517 = vmatpush1.msra.mxu0 %v102_v7 }
   0x8   :  { %v227_v10 = vld [vmem:[%s4178_s1 + $0x5a8] sm:$0xff]  ;;  %v226_v12 = vld [vmem:[%s4178_s1 + $0x5a0] sm:$0xff]  ;;  %594 = vmatpush1.msra.mxu1 %v230_v8  ;;  %518 = vmatprep.subr.mxu0 %v99_v9 }
   0x9   :  { %v95_v13 = vld [vmem:[%s4178_s1 + $0x188] sm:$0xff]  ;;  %595 = vmatprep.subr.mxu1 %v227_v10  ;;  %v94_v15 = vld [vmem:[%s4178_s1 + $0x180] sm:$0xff]  ;;  %519 = vmatpush1.msra.mxu0 %v98_v11 }
   0xa   :  { %v223_v14 = vld [vmem:[%s4178_s1 + $0x588] sm:$0xff]  ;;  %v222_v16 = vld [vmem:[%s4178_s1 + $0x580] sm:$0xff]  ;;  %596 = vmatpush1.msra.mxu1 %v226_v12  ;;  %520 = vmatprep.subr.mxu0 %v95_v13 }
   0xb   :  { %v91_v17 = vld [vmem:[%s4178_s1 + $0x168] sm:$0xff]  ;;  %597 = vmatprep.subr.mxu1 %v223_v14  ;;  %v90_v19 = vld [vmem:[%s4178_s1 + $0x160] sm:$0xff]  ;;  %521 = vmatpush1.msra.mxu0 %v94_v15 }
   0xc   :  { %v219_v18 = vld [vmem:[%s4178_s1 + $0x568] sm:$0xff]  ;;  %v218_v20 = vld [vmem:[%s4178_s1 + $0x560] sm:$0xff]  ;;  %598 = vmatpush1.msra.mxu1 %v222_v16  ;;  %522 = vmatprep.subr.mxu0 %v91_v17 }
   0xd   :  { %v87_v21 = vld [vmem:[%s4178_s1 + $0x148] sm:$0xff]  ;;  %599 = vmatprep.subr.mxu1 %v219_v18  ;;  %v86_v23 = vld [vmem:[%s4178_s1 + $0x140] sm:$0xff]  ;;  %523 = vmatpush1.msra.mxu0 %v90_v19 }
   0xe   :  { %v215_v22 = vld [vmem:[%s4178_s1 + $0x548] sm:$0xff]  ;;  %v214_v24 = vld [vmem:[%s4178_s1 + $0x540] sm:$0xff]  ;;  %600 = vmatpush1.msra.mxu1 %v218_v20  ;;  %524 = vmatprep.subr.mxu0 %v87_v21 }
   0xf   :  { %v83_v25 = vld [vmem:[%s4178_s1 + $0x128] sm:$0xff]  ;;  %601 = vmatprep.subr.mxu1 %v215_v22  ;;  %v82_v27 = vld [vmem:[%s4178_s1 + $0x120] sm:$0xff]  ;;  %525 = vmatpush1.msra.mxu0 %v86_v23 }
  0x10   :  { %v211_v26 = vld [vmem:[%s4178_s1 + $0x528] sm:$0xff]  ;;  %v210_v28 = vld [vmem:[%s4178_s1 + $0x520] sm:$0xff]  ;;  %602 = vmatpush1.msra.mxu1 %v214_v24  ;;  %526 = vmatprep.subr.mxu0 %v83_v25 }
  0x11   :  { %v79_v29 = vld [vmem:[%s4178_s1 + $0x108] sm:$0xff]  ;;  %603 = vmatprep.subr.mxu1 %v211_v26  ;;  %v78_v31 = vld [vmem:[%s4178_s1 + $0x100] sm:$0xff]  ;;  %527 = vmatpush1.msra.mxu0 %v82_v27 }
  0x12   :  { %v207_v30 = vld [vmem:[%s4178_s1 + $0x508] sm:$0xff]  ;;  %v206_v32 = vld [vmem:[%s4178_s1 + $0x500] sm:$0xff]  ;;  %604 = vmatpush1.msra.mxu1 %v210_v28  ;;  %528 = vmatprep.subr.mxu0 %v79_v29 }
  0x13   :  { %v75_v33 = vld [vmem:[%s4178_s1 + $0xe8] sm:$0xff]  ;;  %605 = vmatprep.subr.mxu1 %v207_v30  ;;  %v74_v35 = vld [vmem:[%s4178_s1 + $0xe0] sm:$0xff]  ;;  %529 = vmatpush1.msra.mxu0 %v78_v31 }
  0x14   :  { %v203_v34 = vld [vmem:[%s4178_s1 + $0x4e8] sm:$0xff]  ;;  %v202_v36 = vld [vmem:[%s4178_s1 + $0x4e0] sm:$0xff]  ;;  %606 = vmatpush1.msra.mxu1 %v206_v32  ;;  %530 = vmatprep.subr.mxu0 %v75_v33 }
  0x15   :  { %v71_v37 = vld [vmem:[%s4178_s1 + $0xc8] sm:$0xff]  ;;  %607 = vmatprep.subr.mxu1 %v203_v34  ;;  %v70_v39 = vld [vmem:[%s4178_s1 + $0xc0] sm:$0xff]  ;;  %531 = vmatpush1.msra.mxu0 %v74_v35 }
  0x16   :  { %v199_v38 = vld [vmem:[%s4178_s1 + $0x4c8] sm:$0xff]  ;;  %v198_v40 = vld [vmem:[%s4178_s1 + $0x4c0] sm:$0xff]  ;;  %608 = vmatpush1.msra.mxu1 %v202_v36  ;;  %532 = vmatprep.subr.mxu0 %v71_v37 }
  0x17   :  { %v67_v41 = vld [vmem:[%s4178_s1 + $0xa8] sm:$0xff]  ;;  %609 = vmatprep.subr.mxu1 %v199_v38  ;;  %v66_v43 = vld [vmem:[%s4178_s1 + $0xa0] sm:$0xff]  ;;  %533 = vmatpush1.msra.mxu0 %v70_v39 }
  0x18   :  { %v195_v42 = vld [vmem:[%s4178_s1 + $0x4a8] sm:$0xff]  ;;  %v194_v44 = vld [vmem:[%s4178_s1 + $0x4a0] sm:$0xff]  ;;  %610 = vmatpush1.msra.mxu1 %v198_v40  ;;  %534 = vmatprep.subr.mxu0 %v67_v41 }
  0x19   :  { %v63_v45 = vld [vmem:[%s4178_s1 + $0x88] sm:$0xff]  ;;  %611 = vmatprep.subr.mxu1 %v195_v42  ;;  %v62_v47 = vld [vmem:[%s4178_s1 + $0x80] sm:$0xff]  ;;  %535 = vmatpush1.msra.mxu0 %v66_v43 }
  0x1a   :  { %v191_v46 = vld [vmem:[%s4178_s1 + $0x488] sm:$0xff]  ;;  %v190_v48 = vld [vmem:[%s4178_s1 + $0x480] sm:$0xff]  ;;  %612 = vmatpush1.msra.mxu1 %v194_v44  ;;  %536 = vmatprep.subr.mxu0 %v63_v45 }
  0x1b   :  { %v59_v49 = vld [vmem:[%s4178_s1 + $0x68] sm:$0xff]  ;;  %613 = vmatprep.subr.mxu1 %v191_v46  ;;  %v58_v51 = vld [vmem:[%s4178_s1 + $0x60] sm:$0xff]  ;;  %537 = vmatpush1.msra.mxu0 %v62_v47 }
  0x1c   :  { %v187_v50 = vld [vmem:[%s4178_s1 + $0x468] sm:$0xff]  ;;  %v186_v52 = vld [vmem:[%s4178_s1 + $0x460] sm:$0xff]  ;;  %614 = vmatpush1.msra.mxu1 %v190_v48  ;;  %538 = vmatprep.subr.mxu0 %v59_v49 }
  0x1d   :  { %v55_v53 = vld [vmem:[%s4178_s1 + $0x48] sm:$0xff]  ;;  %615 = vmatprep.subr.mxu1 %v187_v50  ;;  %v54_v55 = vld [vmem:[%s4178_s1 + $0x40] sm:$0xff]  ;;  %539 = vmatpush1.msra.mxu0 %v58_v51 }
  0x1e   :  { %v183_v54 = vld [vmem:[%s4178_s1 + $0x448] sm:$0xff]  ;;  %v182_v56 = vld [vmem:[%s4178_s1 + $0x440] sm:$0xff]  ;;  %616 = vmatpush1.msra.mxu1 %v186_v52  ;;  %540 = vmatprep.subr.mxu0 %v55_v53 }
  0x1f   :  { %v51_v57 = vld [vmem:[%s4178_s1 + $0x28] sm:$0xff]  ;;  %617 = vmatprep.subr.mxu1 %v183_v54  ;;  %v50_v59 = vld [vmem:[%s4178_s1 + $0x20] sm:$0xff]  ;;  %541 = vmatpush1.msra.mxu0 %v54_v55 }
  0x20   :  { %v179_v58 = vld [vmem:[%s4178_s1 + $0x428] sm:$0xff]  ;;  %v178_v60 = vld [vmem:[%s4178_s1 + $0x420] sm:$0xff]  ;;  %618 = vmatpush1.msra.mxu1 %v182_v56  ;;  %542 = vmatprep.subr.mxu0 %v51_v57 }
  0x21   :  { %v47_v61 = vld [vmem:[%s4178_s1 + $0x8] sm:$0xff]  ;;  %619 = vmatprep.subr.mxu1 %v179_v58  ;;  %v46_v63 = vld [vmem:[%s4178_s1] sm:$0xff]  ;;  %543 = vmatpush1.msra.mxu0 %v50_v59 }
  0x22   :  { %v175_v62 = vld [vmem:[%s4178_s1 + $0x408] sm:$0xff]  ;;  %v174_v0 = vld [vmem:[%s4178_s1 + $0x400] sm:$0xff]  ;;  %620 = vmatpush1.msra.mxu1 %v178_v60  ;;  %544 = vmatprep.subr.mxu0 %v47_v61 }
  0x23   :  { %v171_v1 = vld [vmem:[%s4178_s1 + $0x3e8] sm:$0xff]  ;;  %621 = vmatprep.subr.mxu1 %v175_v62  ;;  %v170_v3 = vld [vmem:[%s4178_s1 + $0x3e0] sm:$0xff]  ;;  %545 = vmatpush1.msra.mxu0 %v46_v63 }
  0x24   :  { %v299_v2 = vld [vmem:[%s4178_s1 + $0x7e8] sm:$0xff]  ;;  %v298_v4 = vld [vmem:[%s4178_s1 + $0x7e0] sm:$0xff]  ;;  %622 = vmatpush1.msra.mxu1 %v174_v0  ;;  %546 = vmatprep.subr.mxu0 %v171_v1 }
  0x25   :  { %v167_v5 = vld [vmem:[%s4178_s1 + $0x3c8] sm:$0xff]  ;;  %623 = vmatprep.subr.mxu1 %v299_v2  ;;  %v166_v7 = vld [vmem:[%s4178_s1 + $0x3c0] sm:$0xff]  ;;  %547 = vmatpush2.msra.mxu0 %v170_v3  ;;  %v35_v2 = vld [vmem:[%s4177_s0 + $0x18] sm:$0xff] }
  0x26   :  { %v295_v6 = vld [vmem:[%s4178_s1 + $0x7c8] sm:$0xff]  ;;  %v294_v8 = vld [vmem:[%s4178_s1 + $0x7c0] sm:$0xff]  ;;  %624 = vmatpush2.msra.mxu1 %v298_v4  ;;  %548 = vmatprep.subr.mxu0 %v167_v5  ;;  %v34_v4 = vld [vmem:[%s4177_s0 + $0x10] sm:$0xff] }
  0x27   :  { %v163_v9 = vld [vmem:[%s4178_s1 + $0x3a8] sm:$0xff]  ;;  %625 = vmatprep.subr.mxu1 %v295_v6  ;;  %v162_v11 = vld [vmem:[%s4178_s1 + $0x3a0] sm:$0xff]  ;;  %549 = vmatpush2.msra.mxu0 %v166_v7 }
  0x28   :  { %v291_v10 = vld [vmem:[%s4178_s1 + $0x7a8] sm:$0xff]  ;;  %v290_v12 = vld [vmem:[%s4178_s1 + $0x7a0] sm:$0xff]  ;;  %626 = vmatpush2.msra.mxu1 %v294_v8  ;;  %550 = vmatprep.subr.mxu0 %v163_v9 }
  0x29   :  { %v159_v13 = vld [vmem:[%s4178_s1 + $0x388] sm:$0xff]  ;;  %627 = vmatprep.subr.mxu1 %v291_v10  ;;  %v158_v15 = vld [vmem:[%s4178_s1 + $0x380] sm:$0xff]  ;;  %551 = vmatpush2.msra.mxu0 %v162_v11 }
  0x2a   :  { %v287_v14 = vld [vmem:[%s4178_s1 + $0x788] sm:$0xff]  ;;  %v286_v16 = vld [vmem:[%s4178_s1 + $0x780] sm:$0xff]  ;;  %628 = vmatpush2.msra.mxu1 %v290_v12  ;;  %552 = vmatprep.subr.mxu0 %v159_v13  ;;  %v42_v12 = vld [vmem:[%s4177_s0 + $0x50] sm:$0xff] }
  0x2b   :  { %v155_v17 = vld [vmem:[%s4178_s1 + $0x368] sm:$0xff]  ;;  %629 = vmatprep.subr.mxu1 %v287_v14  ;;  %v154_v19 = vld [vmem:[%s4178_s1 + $0x360] sm:$0xff]  ;;  %553 = vmatpush2.msra.mxu0 %v158_v15  ;;  %v39_v15 = vld [vmem:[%s4177_s0 + $0x38] sm:$0xff] }
  0x2c   :  { %v283_v18 = vld [vmem:[%s4178_s1 + $0x768] sm:$0xff]  ;;  %v282_v20 = vld [vmem:[%s4178_s1 + $0x760] sm:$0xff]  ;;  %630 = vmatpush2.msra.mxu1 %v286_v16  ;;  %554 = vmatprep.subr.mxu0 %v155_v17 }
  0x2d   :  { %v151_v21 = vld [vmem:[%s4178_s1 + $0x348] sm:$0xff]  ;;  %631 = vmatprep.subr.mxu1 %v283_v18  ;;  %v150_v23 = vld [vmem:[%s4178_s1 + $0x340] sm:$0xff]  ;;  %555 = vmatpush2.msra.mxu0 %v154_v19 }
  0x2e   :  { %v279_v22 = vld [vmem:[%s4178_s1 + $0x748] sm:$0xff]  ;;  %v278_v24 = vld [vmem:[%s4178_s1 + $0x740] sm:$0xff]  ;;  %632 = vmatpush2.msra.mxu1 %v282_v20  ;;  %556 = vmatprep.subr.mxu0 %v151_v21 }
  0x2f   :  { %v147_v25 = vld [vmem:[%s4178_s1 + $0x328] sm:$0xff]  ;;  %633 = vmatprep.subr.mxu1 %v279_v22  ;;  %v146_v27 = vld [vmem:[%s4178_s1 + $0x320] sm:$0xff]  ;;  %557 = vmatpush2.msra.mxu0 %v150_v23 }
  0x30   :  { %v275_v26 = vld [vmem:[%s4178_s1 + $0x728] sm:$0xff]  ;;  %v274_v28 = vld [vmem:[%s4178_s1 + $0x720] sm:$0xff]  ;;  %634 = vmatpush2.msra.mxu1 %v278_v24  ;;  %558 = vmatprep.subr.mxu0 %v147_v25 }
  0x31   :  { %v143_v29 = vld [vmem:[%s4178_s1 + $0x308] sm:$0xff]  ;;  %635 = vmatprep.subr.mxu1 %v275_v26  ;;  %v142_v31 = vld [vmem:[%s4178_s1 + $0x300] sm:$0xff]  ;;  %559 = vmatpush2.msra.mxu0 %v146_v27  ;;  %v38_v26 = vld [vmem:[%s4177_s0 + $0x30] sm:$0xff] }
  0x32   :  { %v271_v30 = vld [vmem:[%s4178_s1 + $0x708] sm:$0xff]  ;;  %v270_v32 = vld [vmem:[%s4178_s1 + $0x700] sm:$0xff]  ;;  %636 = vmatpush2.msra.mxu1 %v274_v28  ;;  %560 = vmatprep.subr.mxu0 %v143_v29  ;;  %v109_v27 = vld [vmem:[%s4178_s1 + $0x1f8] sm:$0xff] }
  0x33   :  { %v139_v33 = vld [vmem:[%s4178_s1 + $0x2e8] sm:$0xff]  ;;  %637 = vmatprep.subr.mxu1 %v271_v30  ;;  %v138_v35 = vld [vmem:[%s4178_s1 + $0x2e0] sm:$0xff]  ;;  %561 = vmatpush2.msra.mxu0 %v142_v31  ;;  %v108_v29 = vld [vmem:[%s4178_s1 + $0x1f0] sm:$0xff]  ;;  %v2254_v30 = vmov 0.0  }
  0x34   :  { %v267_v34 = vld [vmem:[%s4178_s1 + $0x6e8] sm:$0xff]  ;;  %v266_v36 = vld [vmem:[%s4178_s1 + $0x6e0] sm:$0xff]  ;;  %638 = vmatpush2.msra.mxu1 %v270_v32  ;;  %562 = vmatprep.subr.mxu0 %v139_v33  ;;  %v105_v32 = vld [vmem:[%s4178_s1 + $0x1d8] sm:$0xff] }
  0x35   :  { %v135_v37 = vld [vmem:[%s4178_s1 + $0x2c8] sm:$0xff]  ;;  %639 = vmatprep.subr.mxu1 %v267_v34  ;;  %v134_v39 = vld [vmem:[%s4178_s1 + $0x2c0] sm:$0xff]  ;;  %563 = vmatpush2.msra.mxu0 %v138_v35  ;;  %v104_v34 = vld [vmem:[%s4178_s1 + $0x1d0] sm:$0xff] }
  0x36   :  { %v263_v38 = vld [vmem:[%s4178_s1 + $0x6c8] sm:$0xff]  ;;  %v262_v40 = vld [vmem:[%s4178_s1 + $0x6c0] sm:$0xff]  ;;  %640 = vmatpush2.msra.mxu1 %v266_v36  ;;  %564 = vmatprep.subr.mxu0 %v135_v37  ;;  %v101_v36 = vld [vmem:[%s4178_s1 + $0x1b8] sm:$0xff] }
  0x37   :  { %v131_v41 = vld [vmem:[%s4178_s1 + $0x2a8] sm:$0xff]  ;;  %641 = vmatprep.subr.mxu1 %v263_v38  ;;  %v130_v43 = vld [vmem:[%s4178_s1 + $0x2a0] sm:$0xff]  ;;  %565 = vmatpush2.msra.mxu0 %v134_v39  ;;  %v100_v38 = vld [vmem:[%s4178_s1 + $0x1b0] sm:$0xff] }
  0x38   :  { %v259_v42 = vld [vmem:[%s4178_s1 + $0x6a8] sm:$0xff]  ;;  %v258_v44 = vld [vmem:[%s4178_s1 + $0x6a0] sm:$0xff]  ;;  %642 = vmatpush2.msra.mxu1 %v262_v40  ;;  %566 = vmatprep.subr.mxu0 %v131_v41  ;;  %v97_v40 = vld [vmem:[%s4178_s1 + $0x198] sm:$0xff] }
  0x39   :  { %v127_v45 = vld [vmem:[%s4178_s1 + $0x288] sm:$0xff]  ;;  %643 = vmatprep.subr.mxu1 %v259_v42  ;;  %v126_v47 = vld [vmem:[%s4178_s1 + $0x280] sm:$0xff]  ;;  %567 = vmatpush2.msra.mxu0 %v130_v43  ;;  %v96_v42 = vld [vmem:[%s4178_s1 + $0x190] sm:$0xff] }
  0x3a   :  { %v255_v46 = vld [vmem:[%s4178_s1 + $0x688] sm:$0xff]  ;;  %v254_v48 = vld [vmem:[%s4178_s1 + $0x680] sm:$0xff]  ;;  %644 = vmatpush2.msra.mxu1 %v258_v44  ;;  %568 = vmatprep.subr.mxu0 %v127_v45  ;;  %v93_v44 = vld [vmem:[%s4178_s1 + $0x178] sm:$0xff] }
  0x3b   :  { %v123_v49 = vld [vmem:[%s4178_s1 + $0x268] sm:$0xff]  ;;  %645 = vmatprep.subr.mxu1 %v255_v46  ;;  %v122_v51 = vld [vmem:[%s4178_s1 + $0x260] sm:$0xff]  ;;  %569 = vmatpush2.msra.mxu0 %v126_v47  ;;  %v92_v46 = vld [vmem:[%s4178_s1 + $0x170] sm:$0xff] }
  0x3c   :  { %v251_v50 = vld [vmem:[%s4178_s1 + $0x668] sm:$0xff]  ;;  %v250_v52 = vld [vmem:[%s4178_s1 + $0x660] sm:$0xff]  ;;  %646 = vmatpush2.msra.mxu1 %v254_v48  ;;  %570 = vmatprep.subr.mxu0 %v123_v49  ;;  %v89_v48 = vld [vmem:[%s4178_s1 + $0x158] sm:$0xff] }
  0x3d   :  { %v119_v53 = vld [vmem:[%s4178_s1 + $0x248] sm:$0xff]  ;;  %647 = vmatprep.subr.mxu1 %v251_v50  ;;  %v118_v55 = vld [vmem:[%s4178_s1 + $0x240] sm:$0xff]  ;;  %571 = vmatpush2.msra.mxu0 %v122_v51  ;;  %v88_v50 = vld [vmem:[%s4178_s1 + $0x150] sm:$0xff] }
  0x3e   :  { %v247_v54 = vld [vmem:[%s4178_s1 + $0x648] sm:$0xff]  ;;  %v246_v56 = vld [vmem:[%s4178_s1 + $0x640] sm:$0xff]  ;;  %648 = vmatpush2.msra.mxu1 %v250_v52  ;;  %572 = vmatprep.subr.mxu0 %v119_v53  ;;  %v85_v52 = vld [vmem:[%s4178_s1 + $0x138] sm:$0xff] }
  0x3f   :  { %v115_v57 = vld [vmem:[%s4178_s1 + $0x228] sm:$0xff]  ;;  %649 = vmatprep.subr.mxu1 %v247_v54  ;;  %v114_v59 = vld [vmem:[%s4178_s1 + $0x220] sm:$0xff]  ;;  %573 = vmatpush2.msra.mxu0 %v118_v55  ;;  %v84_v54 = vld [vmem:[%s4178_s1 + $0x130] sm:$0xff] }
  0x40   :  { %v243_v58 = vld [vmem:[%s4178_s1 + $0x628] sm:$0xff]  ;;  %v242_v60 = vld [vmem:[%s4178_s1 + $0x620] sm:$0xff]  ;;  %650 = vmatpush2.msra.mxu1 %v246_v56  ;;  %574 = vmatprep.subr.mxu0 %v115_v57  ;;  %v81_v56 = vld [vmem:[%s4178_s1 + $0x118] sm:$0xff] }
  0x41   :  { %v111_v61 = vld [vmem:[%s4178_s1 + $0x208] sm:$0xff]  ;;  %651 = vmatprep.subr.mxu1 %v243_v58  ;;  %v110_v63 = vld [vmem:[%s4178_s1 + $0x200] sm:$0xff]  ;;  %575 = vmatpush2.msra.mxu0 %v114_v59  ;;  %v80_v58 = vld [vmem:[%s4178_s1 + $0x110] sm:$0xff] }
  0x42   :  { %v239_v62 = vld [vmem:[%s4178_s1 + $0x608] sm:$0xff]  ;;  %652 = vmatpush2.msra.mxu1 %v242_v60  ;;  %v238_v1 = vld [vmem:[%s4178_s1 + $0x600] sm:$0xff]  ;;  %576 = vmatprep.subr.mxu0 %v111_v61  ;;  %v77_v60 = vld [vmem:[%s4178_s1 + $0xf8] sm:$0xff] }
  0x43   :  { %v2691_v0 = vld [vmem:[%s4177_s0 + $0x8] sm:$0xff]  ;;  %653 = vmatprep.subr.mxu1 %v239_v62  ;;  %v2702_v3 = vld [vmem:[%s4177_s0] sm:$0xff]  ;;  %577 = vmatpush2.msra.mxu0 %v110_v63  ;;  %v76_v62 = vld [vmem:[%s4178_s1 + $0xf0] sm:$0xff] }
  0x44   :  { %578 = vmatprep.mubr.f32.mxu0 %v2691_v0  ;;  %v363_v5 = vld [vmem:[%s4178_s1 + $0x9e8] sm:$0xff]  ;;  %654 = vmatpush2.msra.mxu1 %v238_v1  ;;  %v362_v7 = vld [vmem:[%s4178_s1 + $0x9e0] sm:$0xff]  ;;  %v73_v1 = vld [vmem:[%s4178_s1 + $0xd8] sm:$0xff] }
  0x45   :  { %v443_v6 = vld [vmem:[%s4178_s1 + $0xc68] sm:$0xff]  ;;  %655 = vmatprep.mubr.f32.mxu1 %v35_v2  ;;  %v442_v8 = vld [vmem:[%s4178_s1 + $0xc60] sm:$0xff]  ;;  %579 = vmatmul.mubr.f32.vlgmr.msra.gmra.mxu0 %v2702_v3 }
  0x46   :  { %656 = vmatmul.mubr.f32.vlgmr.msra.gmra.mxu1 %v34_v4  ;;  %v359_v9 = vld [vmem:[%s4178_s1 + $0x9c8] sm:$0xff]  ;;  %668 = vmatprep.subr.mxu0 %v363_v5  ;;  %v40_v11 = vld [vmem:[%s4177_s0 + $0x40] sm:$0xff]  ;;  %v72_v4 = vld [vmem:[%s4178_s1 + $0xd0] sm:$0xff] }
  0x47   :  { %v439_v10 = vld [vmem:[%s4178_s1 + $0xc48] sm:$0xff]  ;;  %769 = vmatprep.subr.mxu1 %v443_v6  ;;  %669 = vmatpush1.msra.mxu0 %v362_v7  ;;  %v358_v13 = vld [vmem:[%s4178_s1 + $0x9c0] sm:$0xff]  ;;  %v69_v6 = vld [vmem:[%s4178_s1 + $0xb8] sm:$0xff] }
  0x48   :  { %770 = vmatpush1.msra.mxu1 %v442_v8  ;;  %v438_v14 = vld [vmem:[%s4178_s1 + $0xc40] sm:$0xff]  ;;  %670 = vmatprep.subr.mxu0 %v359_v9  ;;  %v41_v16 = vld [vmem:[%s4177_s0 + $0x48] sm:$0xff]  ;;  %v68_v8 = vld [vmem:[%s4178_s1 + $0xb0] sm:$0xff] }
  0x49   :  { %771 = vmatprep.subr.mxu1 %v439_v10  ;;  %584 = vmatprep.mubr.f32.mxu0 %v40_v11  ;;  %v355_v17 = vld [vmem:[%s4178_s1 + $0x9a8] sm:$0xff]  ;;  %v354_v19 = vld [vmem:[%s4178_s1 + $0x9a0] sm:$0xff]  ;;  %v65_v10 = vld [vmem:[%s4178_s1 + $0x98] sm:$0xff] }
  0x4a   :  { %661 = vmatprep.mubr.f32.mxu1 %v42_v12  ;;  %v435_v18 = vld [vmem:[%s4178_s1 + $0xc28] sm:$0xff]  ;;  %671 = vmatpush1.msra.mxu0 %v358_v13  ;;  %v434_v20 = vld [vmem:[%s4178_s1 + $0xc20] sm:$0xff]  ;;  %v64_v12 = vld [vmem:[%s4178_s1 + $0x90] sm:$0xff] }
  0x4b   :  { %772 = vmatpush1.msra.mxu1 %v438_v14  ;;  %585 = vmatmul.mubr.f32.gmra.mxu0 %v39_v15  ;;  %v351_v21 = vld [vmem:[%s4178_s1 + $0x988] sm:$0xff]  ;;  %v350_v23 = vld [vmem:[%s4178_s1 + $0x980] sm:$0xff]  ;;  %v61_v14 = vld [vmem:[%s4178_s1 + $0x78] sm:$0xff] }
  0x4c   :  { %662 = vmatmul.mubr.f32.gmra.mxu1 %v41_v16  ;;  %v431_v22 = vld [vmem:[%s4178_s1 + $0xc08] sm:$0xff]  ;;  %672 = vmatprep.subr.mxu0 %v355_v17  ;;  %v430_v24 = vld [vmem:[%s4178_s1 + $0xc00] sm:$0xff]  ;;  %v60_v16 = vld [vmem:[%s4178_s1 + $0x70] sm:$0xff] }
  0x4d   :  { %773 = vmatprep.subr.mxu1 %v435_v18  ;;  %673 = vmatpush1.msra.mxu0 %v354_v19  ;;  %v347_v25 = vld [vmem:[%s4178_s1 + $0x968] sm:$0xff]  ;;  %v346_v28 = vld [vmem:[%s4178_s1 + $0x960] sm:$0xff]  ;;  %v57_v18 = vld [vmem:[%s4178_s1 + $0x58] sm:$0xff] }
  0x4e   :  { %774 = vmatpush1.msra.mxu1 %v434_v20  ;;  %674 = vmatprep.subr.mxu0 %v351_v21  ;;  %v343_v31 = vld [vmem:[%s4178_s1 + $0x948] sm:$0xff]  ;;  %v342_v33 = vld [vmem:[%s4178_s1 + $0x940] sm:$0xff]  ;;  %v56_v20 = vld [vmem:[%s4178_s1 + $0x50] sm:$0xff] }
  0x4f   :  { %775 = vmatprep.subr.mxu1 %v431_v22  ;;  %675 = vmatpush1.msra.mxu0 %v350_v23  ;;  %v339_v35 = vld [vmem:[%s4178_s1 + $0x928] sm:$0xff]  ;;  %v338_v37 = vld [vmem:[%s4178_s1 + $0x920] sm:$0xff]  ;;  %v53_v22 = vld [vmem:[%s4178_s1 + $0x38] sm:$0xff] }
  0x50   :  { %776 = vmatpush1.msra.mxu1 %v430_v24  ;;  %809 = vmatprep.mubr.f32.mxu1 %v2254_v30  ;;  %v335_v39 = vld [vmem:[%s4178_s1 + $0x908] sm:$0xff]  ;;  %v334_v41 = vld [vmem:[%s4178_s1 + $0x900] sm:$0xff]  ;;  %v52_v24 = vld [vmem:[%s4178_s1 + $0x30] sm:$0xff] }
  0x51   :  { %676 = vmatprep.subr.mxu0 %v347_v25  ;;  %2049 = vmatmul.mubr.msk.f32.vlgmr.msra.gmra.mxu1 %vm507_vm0, %v38_v26  ;;  %v331_v43 = vld [vmem:[%s4178_s1 + $0x8e8] sm:$0xff]  ;;  %v330_v45 = vld [vmem:[%s4178_s1 + $0x8e0] sm:$0xff]  ;;  %v49_v26 = vld [vmem:[%s4178_s1 + $0x18] sm:$0xff] }
  0x52   :  { %822 = vmatprep.subr.mxu1 %v109_v27  ;;  %677 = vmatpush1.msra.mxu0 %v346_v28  ;;  %v327_v47 = vld [vmem:[%s4178_s1 + $0x8c8] sm:$0xff]  ;;  %v326_v49 = vld [vmem:[%s4178_s1 + $0x8c0] sm:$0xff]  ;;  %v48_v28 = vld [vmem:[%s4178_s1 + $0x10] sm:$0xff] }
  0x53   :  { %823 = vmatpush1.msra.mxu1 %v108_v29  ;;  %678 = vmatprep.subr.mxu0 %v343_v31  ;;  %v323_v51 = vld [vmem:[%s4178_s1 + $0x8a8] sm:$0xff]  ;;  %v322_v53 = vld [vmem:[%s4178_s1 + $0x8a0] sm:$0xff]  ;;  %v173_v31 = vld [vmem:[%s4178_s1 + $0x3f8] sm:$0xff] }
  0x54   :  { %824 = vmatprep.subr.mxu1 %v105_v32  ;;  %679 = vmatpush1.msra.mxu0 %v342_v33  ;;  %v319_v55 = vld [vmem:[%s4178_s1 + $0x888] sm:$0xff]  ;;  %v318_v57 = vld [vmem:[%s4178_s1 + $0x880] sm:$0xff]  ;;  %v172_v33 = vld [vmem:[%s4178_s1 + $0x3f0] sm:$0xff] }
  0x55   :  { %825 = vmatpush1.msra.mxu1 %v104_v34  ;;  %680 = vmatprep.subr.mxu0 %v339_v35  ;;  %v315_v59 = vld [vmem:[%s4178_s1 + $0x868] sm:$0xff]  ;;  %v314_v61 = vld [vmem:[%s4178_s1 + $0x860] sm:$0xff]  ;;  %v169_v35 = vld [vmem:[%s4178_s1 + $0x3d8] sm:$0xff] }
  0x56   :  { %826 = vmatprep.subr.mxu1 %v101_v36  ;;  %681 = vmatpush1.msra.mxu0 %v338_v37  ;;  %v311_v63 = vld [vmem:[%s4178_s1 + $0x848] sm:$0xff]  ;;  %v310_v2 = vld [vmem:[%s4178_s1 + $0x840] sm:$0xff]  ;;  %v168_v37 = vld [vmem:[%s4178_s1 + $0x3d0] sm:$0xff] }
  0x57   :  { %827 = vmatpush1.msra.mxu1 %v100_v38  ;;  %682 = vmatprep.subr.mxu0 %v335_v39  ;;  %v307_v5 = vld [vmem:[%s4178_s1 + $0x828] sm:$0xff]  ;;  %v306_v7 = vld [vmem:[%s4178_s1 + $0x820] sm:$0xff]  ;;  %v165_v39 = vld [vmem:[%s4178_s1 + $0x3b8] sm:$0xff] }
  0x58   :  { %828 = vmatprep.subr.mxu1 %v97_v40  ;;  %683 = vmatpush1.msra.mxu0 %v334_v41  ;;  %v303_v9 = vld [vmem:[%s4178_s1 + $0x808] sm:$0xff]  ;;  %v302_v11 = vld [vmem:[%s4178_s1 + $0x800] sm:$0xff]  ;;  %v164_v41 = vld [vmem:[%s4178_s1 + $0x3b0] sm:$0xff] }
  0x59   :  { %829 = vmatpush1.msra.mxu1 %v96_v42  ;;  %684 = vmatprep.subr.mxu0 %v331_v43  ;;  %v427_v13 = vld [vmem:[%s4178_s1 + $0xbe8] sm:$0xff]  ;;  %v426_v15 = vld [vmem:[%s4178_s1 + $0xbe0] sm:$0xff]  ;;  %v161_v43 = vld [vmem:[%s4178_s1 + $0x398] sm:$0xff] }
  0x5a   :  { %830 = vmatprep.subr.mxu1 %v93_v44  ;;  %685 = vmatpush1.msra.mxu0 %v330_v45  ;;  %v423_v17 = vld [vmem:[%s4178_s1 + $0xbc8] sm:$0xff]  ;;  %v422_v19 = vld [vmem:[%s4178_s1 + $0xbc0] sm:$0xff]  ;;  %v160_v45 = vld [vmem:[%s4178_s1 + $0x390] sm:$0xff] }
  0x5b   :  { %831 = vmatpush1.msra.mxu1 %v92_v46  ;;  %686 = vmatprep.subr.mxu0 %v327_v47  ;;  %v419_v21 = vld [vmem:[%s4178_s1 + $0xba8] sm:$0xff]  ;;  %v418_v23 = vld [vmem:[%s4178_s1 + $0xba0] sm:$0xff]  ;;  %v157_v47 = vld [vmem:[%s4178_s1 + $0x378] sm:$0xff] }
  0x5c   :  { %832 = vmatprep.subr.mxu1 %v89_v48  ;;  %687 = vmatpush1.msra.mxu0 %v326_v49  ;;  %v415_v25 = vld [vmem:[%s4178_s1 + $0xb88] sm:$0xff]  ;;  %v414_v27 = vld [vmem:[%s4178_s1 + $0xb80] sm:$0xff]  ;;  %v156_v49 = vld [vmem:[%s4178_s1 + $0x370] sm:$0xff] }
  0x5d   :  { %833 = vmatpush1.msra.mxu1 %v88_v50  ;;  %688 = vmatprep.subr.mxu0 %v323_v51  ;;  %v411_v29 = vld [vmem:[%s4178_s1 + $0xb68] sm:$0xff]  ;;  %v410_v32 = vld [vmem:[%s4178_s1 + $0xb60] sm:$0xff]  ;;  %v153_v51 = vld [vmem:[%s4178_s1 + $0x358] sm:$0xff] }
  0x5e   :  { %834 = vmatprep.subr.mxu1 %v85_v52  ;;  %689 = vmatpush1.msra.mxu0 %v322_v53  ;;  %v407_v34 = vld [vmem:[%s4178_s1 + $0xb48] sm:$0xff]  ;;  %v406_v36 = vld [vmem:[%s4178_s1 + $0xb40] sm:$0xff]  ;;  %v152_v53 = vld [vmem:[%s4178_s1 + $0x350] sm:$0xff] }
  0x5f   :  { %835 = vmatpush1.msra.mxu1 %v84_v54  ;;  %690 = vmatprep.subr.mxu0 %v319_v55  ;;  %v403_v38 = vld [vmem:[%s4178_s1 + $0xb28] sm:$0xff]  ;;  %v402_v40 = vld [vmem:[%s4178_s1 + $0xb20] sm:$0xff]  ;;  %v149_v55 = vld [vmem:[%s4178_s1 + $0x338] sm:$0xff] }
  0x60   :  { %836 = vmatprep.subr.mxu1 %v81_v56  ;;  %691 = vmatpush1.msra.mxu0 %v318_v57  ;;  %v399_v42 = vld [vmem:[%s4178_s1 + $0xb08] sm:$0xff]  ;;  %v398_v44 = vld [vmem:[%s4178_s1 + $0xb00] sm:$0xff]  ;;  %v148_v57 = vld [vmem:[%s4178_s1 + $0x330] sm:$0xff] }
  0x61   :  { %837 = vmatpush1.msra.mxu1 %v80_v58  ;;  %692 = vmatprep.subr.mxu0 %v315_v59  ;;  %v395_v46 = vld [vmem:[%s4178_s1 + $0xae8] sm:$0xff]  ;;  %v394_v48 = vld [vmem:[%s4178_s1 + $0xae0] sm:$0xff]  ;;  %v145_v59 = vld [vmem:[%s4178_s1 + $0x318] sm:$0xff] }
  0x62   :  { %838 = vmatprep.subr.mxu1 %v77_v60  ;;  %693 = vmatpush1.msra.mxu0 %v314_v61  ;;  %v391_v50 = vld [vmem:[%s4178_s1 + $0xac8] sm:$0xff]  ;;  %v390_v52 = vld [vmem:[%s4178_s1 + $0xac0] sm:$0xff]  ;;  %v144_v61 = vld [vmem:[%s4178_s1 + $0x310] sm:$0xff] }
  0x63   :  { %839 = vmatpush1.msra.mxu1 %v76_v62  ;;  %694 = vmatprep.subr.mxu0 %v311_v63  ;;  %v387_v54 = vld [vmem:[%s4178_s1 + $0xaa8] sm:$0xff]  ;;  %v386_v56 = vld [vmem:[%s4178_s1 + $0xaa0] sm:$0xff]  ;;  %v141_v63 = vld [vmem:[%s4178_s1 + $0x2f8] sm:$0xff] }
  0x64   :  { %840 = vmatprep.subr.mxu1 %v73_v1  ;;  %695 = vmatpush1.msra.mxu0 %v310_v2  ;;  %v383_v58 = vld [vmem:[%s4178_s1 + $0xa88] sm:$0xff]  ;;  %v382_v60 = vld [vmem:[%s4178_s1 + $0xa80] sm:$0xff]  ;;  %v140_v2 = vld [vmem:[%s4178_s1 + $0x2f0] sm:$0xff] }
  0x65   :  { %841 = vmatpush1.msra.mxu1 %v72_v4  ;;  %696 = vmatprep.subr.mxu0 %v307_v5  ;;  %v379_v62 = vld [vmem:[%s4178_s1 + $0xa68] sm:$0xff]  ;;  %v378_v1 = vld [vmem:[%s4178_s1 + $0xa60] sm:$0xff]  ;;  %v137_v5 = vld [vmem:[%s4178_s1 + $0x2d8] sm:$0xff] }
  0x66   :  { %842 = vmatprep.subr.mxu1 %v69_v6  ;;  %697 = vmatpush1.msra.mxu0 %v306_v7  ;;  %v375_v4 = vld [vmem:[%s4178_s1 + $0xa48] sm:$0xff]  ;;  %v374_v6 = vld [vmem:[%s4178_s1 + $0xa40] sm:$0xff]  ;;  %v136_v7 = vld [vmem:[%s4178_s1 + $0x2d0] sm:$0xff] }
  0x67   :  { %843 = vmatpush1.msra.mxu1 %v68_v8  ;;  %698 = vmatprep.subr.mxu0 %v303_v9  ;;  %v371_v8 = vld [vmem:[%s4178_s1 + $0xa28] sm:$0xff]  ;;  %v133_v9 = vld [vmem:[%s4178_s1 + $0x2b8] sm:$0xff] }
  0x68   :  { %844 = vmatprep.subr.mxu1 %v65_v10  ;;  %699 = vmatpush1.msra.mxu0 %v302_v11  ;;  %v370_v10 = vld [vmem:[%s4178_s1 + $0xa20] sm:$0xff]  ;;  %v132_v11 = vld [vmem:[%s4178_s1 + $0x2b0] sm:$0xff] }
  0x69   :  { %845 = vmatpush1.msra.mxu1 %v64_v12  ;;  %700 = vmatprep.subr.mxu0 %v427_v13  ;;  %v367_v12 = vld [vmem:[%s4178_s1 + $0xa08] sm:$0xff]  ;;  %v129_v13 = vld [vmem:[%s4178_s1 + $0x298] sm:$0xff] }
  0x6a   :  { %846 = vmatprep.subr.mxu1 %v61_v14  ;;  %701 = vmatpush2.msra.mxu0 %v426_v15  ;;  %v366_v14 = vld [vmem:[%s4178_s1 + $0xa00] sm:$0xff]  ;;  %v3110_v15 = vld [vmem:[%s4177_s0 + $0x28] sm:$0xff] }
  0x6b   :  { %847 = vmatpush1.msra.mxu1 %v60_v16  ;;  %702 = vmatprep.subr.mxu0 %v423_v17  ;;  %v128_v16 = vld [vmem:[%s4178_s1 + $0x290] sm:$0xff]  ;;  %v3118_v17 = vld [vmem:[%s4177_s0 + $0x20] sm:$0xff] }
  0x6c   :  { %848 = vmatprep.subr.mxu1 %v57_v18  ;;  %703 = vmatpush2.msra.mxu0 %v422_v19  ;;  %v125_v18 = vld [vmem:[%s4178_s1 + $0x278] sm:$0xff] }
  0x6d   :  { %849 = vmatpush1.msra.mxu1 %v56_v20  ;;  %704 = vmatprep.subr.mxu0 %v419_v21  ;;  %v237_v19 = vld [vmem:[%s4178_s1 + $0x5f8] sm:$0xff]  ;;  %v124_v20 = vld [vmem:[%s4178_s1 + $0x270] sm:$0xff] }
  0x6e   :  { %850 = vmatprep.subr.mxu1 %v53_v22  ;;  %705 = vmatpush2.msra.mxu0 %v418_v23  ;;  %v236_v21 = vld [vmem:[%s4178_s1 + $0x5f0] sm:$0xff]  ;;  %v121_v22 = vld [vmem:[%s4178_s1 + $0x258] sm:$0xff] }
  0x6f   :  { %851 = vmatpush1.msra.mxu1 %v52_v24  ;;  %706 = vmatprep.subr.mxu0 %v415_v25  ;;  %v233_v23 = vld [vmem:[%s4178_s1 + $0x5d8] sm:$0xff]  ;;  %v3143_v24 = vld [vmem:[%s4177_s0 + $0x60] sm:$0xff]  ;;  %v3148_v25 = vld [vmem:[%s4177_s0 + $0x68] sm:$0xff] }
  0x70   :  { %852 = vmatprep.subr.mxu1 %v49_v26  ;;  %707 = vmatpush2.msra.mxu0 %v414_v27  ;;  %v232_v26 = vld [vmem:[%s4178_s1 + $0x5d0] sm:$0xff] }
  0x71   :  { %853 = vmatpush1.msra.mxu1 %v48_v28  ;;  %708 = vmatprep.subr.mxu0 %v411_v29  ;;  %v120_v27 = vld [vmem:[%s4178_s1 + $0x250] sm:$0xff]  ;;  %v3160_v28 = vld [vmem:[%s4177_s0 + $0x58] sm:$0xff] }
  0x72   :  { %854 = vmatprep.subr.mxu1 %v173_v31  ;;  %709 = vmatpush2.msra.mxu0 %v410_v32  ;;  %v117_v29 = vld [vmem:[%s4178_s1 + $0x238] sm:$0xff] }
  0x73   :  { %855 = vmatpush2.msra.mxu1 %v172_v33  ;;  %710 = vmatprep.subr.mxu0 %v407_v34  ;;  %v229_v31 = vld [vmem:[%s4178_s1 + $0x5b8] sm:$0xff] }
  0x74   :  { %856 = vmatprep.subr.mxu1 %v169_v35  ;;  %711 = vmatpush2.msra.mxu0 %v406_v36 }
  0x75   :  { %857 = vmatpush2.msra.mxu1 %v168_v37  ;;  %712 = vmatprep.subr.mxu0 %v403_v38 }
  0x76   :  { %858 = vmatprep.subr.mxu1 %v165_v39  ;;  %713 = vmatpush2.msra.mxu0 %v402_v40 }
  0x77   :  { %859 = vmatpush2.msra.mxu1 %v164_v41  ;;  %714 = vmatprep.subr.mxu0 %v399_v42 }
  0x78   :  { %860 = vmatprep.subr.mxu1 %v161_v43  ;;  %715 = vmatpush2.msra.mxu0 %v398_v44 }
  0x79   :  { %861 = vmatpush2.msra.mxu1 %v160_v45  ;;  %716 = vmatprep.subr.mxu0 %v395_v46 }
  0x7a   :  { %862 = vmatprep.subr.mxu1 %v157_v47  ;;  %717 = vmatpush2.msra.mxu0 %v394_v48 }
  0x7b   :  { %863 = vmatpush2.msra.mxu1 %v156_v49  ;;  %718 = vmatprep.subr.mxu0 %v391_v50 }
  0x7c   :  { %864 = vmatprep.subr.mxu1 %v153_v51  ;;  %719 = vmatpush2.msra.mxu0 %v390_v52 }
  0x7d   :  { %865 = vmatpush2.msra.mxu1 %v152_v53  ;;  %720 = vmatprep.subr.mxu0 %v387_v54 }
  0x7e   :  { %866 = vmatprep.subr.mxu1 %v149_v55  ;;  %721 = vmatpush2.msra.mxu0 %v386_v56 }
  0x7f   :  { %867 = vmatpush2.msra.mxu1 %v148_v57  ;;  %722 = vmatprep.subr.mxu0 %v383_v58 }
  0x80   :  { %868 = vmatprep.subr.mxu1 %v145_v59  ;;  %723 = vmatpush2.msra.mxu0 %v382_v60 }
  0x81   :  { %869 = vmatpush2.msra.mxu1 %v144_v61  ;;  %724 = vmatprep.subr.mxu0 %v379_v62 }
  0x82   :  { %870 = vmatprep.subr.mxu1 %v141_v63  ;;  %725 = vmatpush2.msra.mxu0 %v378_v1 }
  0x83   :  { %871 = vmatpush2.msra.mxu1 %v140_v2  ;;  %726 = vmatprep.subr.mxu0 %v375_v4 }
  0x84   :  { %872 = vmatprep.subr.mxu1 %v137_v5  ;;  %727 = vmatpush2.msra.mxu0 %v374_v6 }
  0x85   :  { %873 = vmatpush2.msra.mxu1 %v136_v7  ;;  %728 = vmatprep.subr.mxu0 %v371_v8 }
  0x86   :  { %874 = vmatprep.subr.mxu1 %v133_v9  ;;  %729 = vmatpush2.msra.mxu0 %v370_v10 }
  0x87   :  { %875 = vmatpush2.msra.mxu1 %v132_v11  ;;  %730 = vmatprep.subr.mxu0 %v367_v12 }
  0x88   :  { %876 = vmatprep.subr.mxu1 %v129_v13  ;;  %731 = vmatpush2.msra.mxu0 %v366_v14 }
  0x89   :  { %732 = vmatprep.mubr.f32.mxu0 %v3110_v15  ;;  %877 = vmatpush2.msra.mxu1 %v128_v16 }
  0x8a   :  { %733 = vmatmul.mubr.f32.vlgmr.msra.gmra.mxu0 %v3118_v17  ;;  %878 = vmatprep.subr.mxu1 %v125_v18 }
  0x8b   :  { %899 = vmatprep.subr.mxu0 %v237_v19  ;;  %879 = vmatpush2.msra.mxu1 %v124_v20 }
  0x8c   :  { %900 = vmatpush1.msra.mxu0 %v236_v21  ;;  %815 = vmatprep.mubr.f32.mxu1 %v2254_v30 }
  0x8d   :  { %880 = vmatprep.subr.mxu1 %v121_v22  ;;  %901 = vmatprep.subr.mxu0 %v233_v23 }
  0x8e   :  { %738 = vmatprep.mubr.f32.mxu0 %v3143_v24 }
  0x8f   :  { %17 = vsyncpa [#allocation6], 0  ;;  %2050 = vmatmul.mubr.msk.f32.gmra.mxu1 %vm507_vm0, %v3148_v25  ;;  %902 = vmatpush1.msra.mxu0 %v232_v26  ;;  %v116_v32 = vld [vmem:[%s4178_s1 + $0x230] sm:$0xff]  ;;  %v113_v34 = vld [vmem:[%s4178_s1 + $0x218] sm:$0xff]  ;;  %vm1485_vm1 = vcmask 130048   ;;  %vm2256_vm2 = vmmov 0  }
  0x90   :  { %v228_v33 = vld [vmem:[%s4178_s1 + $0x5b0] sm:$0xff]  ;;  %881 = vmatpush2.msra.mxu1 %v120_v27  ;;  %739 = vmatmul.mubr.f32.gmra.mxu0 %v3160_v28  ;;  %v225_v35 = vld [vmem:[%s4178_s1 + $0x598] sm:$0xff]  ;;  %vm1832_vm4 = vcmask 7168   ;;  %s2257_s13 = smov [#allocation5]  }
  0x91   :  { %882 = vmatprep.subr.mxu1 %v117_v29  ;;  %903 = vmatprep.subr.mxu0 %v229_v31  ;;  %v112_v36 = vld [vmem:[%s4178_s1 + $0x210] sm:$0xff]  ;;  %v221_v38 = vld [vmem:[%s4178_s1 + $0x578] sm:$0xff]  ;;  %s2037_s14 = sshll.u32 %s2257_s13, 4  ;;  %s2038_s14 = int_to_ptr.vmem [resolvable:$true] %s2037_s14 }
  0x92   :  { %883 = vmatpush2.msra.mxu1 %v116_v32  ;;  %904 = vmatpush1.msra.mxu0 %v228_v33  ;;  %v224_v37 = vld [vmem:[%s4178_s1 + $0x590] sm:$0xff]  ;;  %v365_v39 = vld [vmem:[%s4178_s1 + $0x9f8] sm:$0xff]  ;;  %s2210_s4 = scalar_lea.vmem %s2038_s14, 16  ;;  %s2214_s15 = scalar_lea.vmem %s2038_s14, 32 }
  0x93   :  { %884 = vmatprep.subr.mxu1 %v113_v34  ;;  %905 = vmatprep.subr.mxu0 %v225_v35  ;;  %v220_v40 = vld [vmem:[%s4178_s1 + $0x570] sm:$0xff]  ;;  %v217_v42 = vld [vmem:[%s4178_s1 + $0x558] sm:$0xff]  ;;  %p2211_p0 = scmp.ne.s32.totalorder %s2038_s14, %s2210_s4  ;;  %p2215_p1 = scmp.lt.s32.totalorder %s2038_s14, %s2038_s14 }
  0x94   :  { %885 = vmatpush2.msra.mxu1 %v112_v36  ;;  %886 = vmatprep.mubr.f32.mxu1 %v2691_v0  ;;  %v364_v41 = vld [vmem:[%s4178_s1 + $0x9f0] sm:$0xff]  ;;  %v361_v43 = vld [vmem:[%s4178_s1 + $0x9d8] sm:$0xff]  ;;  %p2216_p2 = scmp.lt.s32.totalorder %s2214_s15, %s2210_s4 }
  0x95   :  { %906 = vmatpush1.msra.mxu0 %v224_v37  ;;  %887 = vmatmul.mubr.f32.vlgmr.msra.gmra.mxu1 %v2702_v3  ;;  %v216_v0 = vld [vmem:[%s4178_s1 + $0x550] sm:$0xff]  ;;  %v213_v3 = vld [vmem:[%s4178_s1 + $0x538] sm:$0xff] }
  0x96   :  { %907 = vmatprep.subr.mxu0 %v221_v38  ;;  %976 = vmatprep.subr.mxu1 %v365_v39  ;;  %v360_v44 = vld [vmem:[%s4178_s1 + $0x9d0] sm:$0xff]  ;;  %v357_v45 = vld [vmem:[%s4178_s1 + $0x9b8] sm:$0xff]  ;;  %p2217_p3 = por %p2216_p2, %p2215_p1 }
  0x97   :  { %908 = vmatpush1.msra.mxu0 %v220_v40  ;;  %977 = vmatpush1.msra.mxu1 %v364_v41  ;;  %v212_v46 = vld [vmem:[%s4178_s1 + $0x530] sm:$0xff]  ;;  %v209_v48 = vld [vmem:[%s4178_s1 + $0x518] sm:$0xff] }
  0x98   :  { %909 = vmatprep.subr.mxu0 %v217_v42  ;;  %978 = vmatprep.subr.mxu1 %v361_v43  ;;  %v356_v47 = vld [vmem:[%s4178_s1 + $0x9b0] sm:$0xff]  ;;  %v353_v49 = vld [vmem:[%s4178_s1 + $0x998] sm:$0xff]  ;;  %p2218_p4 = pnand %p2217_p3, %p2211_p0 }
  0x99   :  { %910 = vmatpush1.msra.mxu0 %v216_v0  ;;  %979 = vmatpush1.msra.mxu1 %v360_v44  ;;  %v208_v50 = vld [vmem:[%s4178_s1 + $0x510] sm:$0xff]  ;;  %v205_v52 = vld [vmem:[%s4178_s1 + $0x4f8] sm:$0xff] }
  0x9a   :  { %911 = vmatprep.subr.mxu0 %v213_v3  ;;  %980 = vmatprep.subr.mxu1 %v357_v45  ;;  %v352_v51 = vld [vmem:[%s4178_s1 + $0x990] sm:$0xff]  ;;  %v349_v53 = vld [vmem:[%s4178_s1 + $0x978] sm:$0xff] }
  0x9b   :  { %912 = vmatpush1.msra.mxu0 %v212_v46  ;;  %981 = vmatpush1.msra.mxu1 %v356_v47  ;;  %v204_v54 = vld [vmem:[%s4178_s1 + $0x4f0] sm:$0xff]  ;;  %v201_v56 = vld [vmem:[%s4178_s1 + $0x4d8] sm:$0xff] }
  0x9c   :  { %913 = vmatprep.subr.mxu0 %v209_v48  ;;  %982 = vmatprep.subr.mxu1 %v353_v49  ;;  %v348_v55 = vld [vmem:[%s4178_s1 + $0x970] sm:$0xff]  ;;  %v345_v57 = vld [vmem:[%s4178_s1 + $0x958] sm:$0xff] }
  0x9d   :  { %914 = vmatpush1.msra.mxu0 %v208_v50  ;;  %983 = vmatpush1.msra.mxu1 %v352_v51  ;;  %v200_v58 = vld [vmem:[%s4178_s1 + $0x4d0] sm:$0xff]  ;;  %v197_v60 = vld [vmem:[%s4178_s1 + $0x4b8] sm:$0xff] }
  0x9e   :  { %915 = vmatprep.subr.mxu0 %v205_v52  ;;  %984 = vmatprep.subr.mxu1 %v349_v53  ;;  %v344_v59 = vld [vmem:[%s4178_s1 + $0x950] sm:$0xff]  ;;  %v341_v61 = vld [vmem:[%s4178_s1 + $0x938] sm:$0xff] }
  0x9f   :  { %916 = vmatpush1.msra.mxu0 %v204_v54  ;;  %985 = vmatpush1.msra.mxu1 %v348_v55  ;;  %v196_v62 = vld [vmem:[%s4178_s1 + $0x4b0] sm:$0xff]  ;;  %v193_v1 = vld [vmem:[%s4178_s1 + $0x498] sm:$0xff] }
  0xa0   :  { %917 = vmatprep.subr.mxu0 %v201_v56  ;;  %986 = vmatprep.subr.mxu1 %v345_v57  ;;  %v340_v63 = vld [vmem:[%s4178_s1 + $0x930] sm:$0xff]  ;;  %v337_v2 = vld [vmem:[%s4178_s1 + $0x918] sm:$0xff] }
  0xa1   :  { %918 = vmatpush1.msra.mxu0 %v200_v58  ;;  %987 = vmatpush1.msra.mxu1 %v344_v59  ;;  %v192_v4 = vld [vmem:[%s4178_s1 + $0x490] sm:$0xff]  ;;  %v189_v6 = vld [vmem:[%s4178_s1 + $0x478] sm:$0xff] }
  0xa2   :  { %919 = vmatprep.subr.mxu0 %v197_v60  ;;  %988 = vmatprep.subr.mxu1 %v341_v61  ;;  %v336_v5 = vld [vmem:[%s4178_s1 + $0x910] sm:$0xff]  ;;  %v333_v7 = vld [vmem:[%s4178_s1 + $0x8f8] sm:$0xff] }
  0xa3   :  { %920 = vmatpush1.msra.mxu0 %v196_v62  ;;  %989 = vmatpush1.msra.mxu1 %v340_v63  ;;  %v188_v8 = vld [vmem:[%s4178_s1 + $0x470] sm:$0xff]  ;;  %v185_v10 = vld [vmem:[%s4178_s1 + $0x458] sm:$0xff] }
  0xa4   :  { %921 = vmatprep.subr.mxu0 %v193_v1  ;;  %990 = vmatprep.subr.mxu1 %v337_v2  ;;  %v332_v9 = vld [vmem:[%s4178_s1 + $0x8f0] sm:$0xff]  ;;  %v329_v11 = vld [vmem:[%s4178_s1 + $0x8d8] sm:$0xff] }
  0xa5   :  { %922 = vmatpush1.msra.mxu0 %v192_v4  ;;  %991 = vmatpush1.msra.mxu1 %v336_v5  ;;  %v184_v12 = vld [vmem:[%s4178_s1 + $0x450] sm:$0xff]  ;;  %v181_v14 = vld [vmem:[%s4178_s1 + $0x438] sm:$0xff] }
  0xa6   :  { %923 = vmatprep.subr.mxu0 %v189_v6  ;;  %992 = vmatprep.subr.mxu1 %v333_v7  ;;  %v328_v13 = vld [vmem:[%s4178_s1 + $0x8d0] sm:$0xff]  ;;  %v325_v16 = vld [vmem:[%s4178_s1 + $0x8b8] sm:$0xff] }
  0xa7   :  { %924 = vmatpush1.msra.mxu0 %v188_v8  ;;  %993 = vmatpush1.msra.mxu1 %v332_v9  ;;  %v180_v18 = vld [vmem:[%s4178_s1 + $0x430] sm:$0xff]  ;;  %v177_v20 = vld [vmem:[%s4178_s1 + $0x418] sm:$0xff] }
  0xa8   :  { %925 = vmatprep.subr.mxu0 %v185_v10  ;;  %994 = vmatprep.subr.mxu1 %v329_v11  ;;  %v324_v19 = vld [vmem:[%s4178_s1 + $0x8b0] sm:$0xff]  ;;  %v321_v21 = vld [vmem:[%s4178_s1 + $0x898] sm:$0xff] }
  0xa9   :  { %926 = vmatpush1.msra.mxu0 %v184_v12  ;;  %995 = vmatpush1.msra.mxu1 %v328_v13  ;;  %v176_v22 = vld [vmem:[%s4178_s1 + $0x410] sm:$0xff]  ;;  %v301_v26 = vld [vmem:[%s4178_s1 + $0x7f8] sm:$0xff] }
  0xaa   :  { %927 = vmatprep.subr.mxu0 %v181_v14  ;;  %996 = vmatprep.subr.mxu1 %v325_v16  ;;  %v320_v23 = vld [vmem:[%s4178_s1 + $0x890] sm:$0xff]  ;;  %v317_v27 = vld [vmem:[%s4178_s1 + $0x878] sm:$0xff] }
  0xab   :  { %928 = vmatpush1.msra.mxu0 %v180_v18  ;;  %997 = vmatpush1.msra.mxu1 %v324_v19  ;;  %v300_v29 = vld [vmem:[%s4178_s1 + $0x7f0] sm:$0xff]  ;;  %v297_v32 = vld [vmem:[%s4178_s1 + $0x7d8] sm:$0xff] }
  0xac   :  { %929 = vmatprep.subr.mxu0 %v177_v20  ;;  %998 = vmatprep.subr.mxu1 %v321_v21  ;;  %v316_v31 = vld [vmem:[%s4178_s1 + $0x870] sm:$0xff]  ;;  %v313_v33 = vld [vmem:[%s4178_s1 + $0x858] sm:$0xff] }
  0xad   :  { %930 = vmatpush1.msra.mxu0 %v176_v22  ;;  %999 = vmatpush1.msra.mxu1 %v320_v23  ;;  %v296_v34 = vld [vmem:[%s4178_s1 + $0x7d0] sm:$0xff]  ;;  %v293_v36 = vld [vmem:[%s4178_s1 + $0x7b8] sm:$0xff] }
  0xae   :  { %931 = vmatprep.subr.mxu0 %v301_v26  ;;  %1000 = vmatprep.subr.mxu1 %v317_v27  ;;  %v312_v35 = vld [vmem:[%s4178_s1 + $0x850] sm:$0xff]  ;;  %v309_v37 = vld [vmem:[%s4178_s1 + $0x838] sm:$0xff] }
  0xaf   :  { %932 = vmatpush2.msra.mxu0 %v300_v29  ;;  %1001 = vmatpush1.msra.mxu1 %v316_v31  ;;  %v292_v38 = vld [vmem:[%s4178_s1 + $0x7b0] sm:$0xff]  ;;  %v289_v40 = vld [vmem:[%s4178_s1 + $0x798] sm:$0xff] }
  0xb0   :  { %933 = vmatprep.subr.mxu0 %v297_v32  ;;  %1002 = vmatprep.subr.mxu1 %v313_v33  ;;  %v308_v39 = vld [vmem:[%s4178_s1 + $0x830] sm:$0xff]  ;;  %v305_v41 = vld [vmem:[%s4178_s1 + $0x818] sm:$0xff] }
  0xb1   :  { %934 = vmatpush2.msra.mxu0 %v296_v34  ;;  %1003 = vmatpush1.msra.mxu1 %v312_v35  ;;  %v288_v42 = vld [vmem:[%s4178_s1 + $0x790] sm:$0xff]  ;;  %v285_v0 = vld [vmem:[%s4178_s1 + $0x778] sm:$0xff] }
  0xb2   :  { %935 = vmatprep.subr.mxu0 %v293_v36  ;;  %1004 = vmatprep.subr.mxu1 %v309_v37  ;;  %v304_v43 = vld [vmem:[%s4178_s1 + $0x810] sm:$0xff]  ;;  %v429_v44 = vld [vmem:[%s4178_s1 + $0xbf8] sm:$0xff] }
  0xb3   :  { %936 = vmatpush2.msra.mxu0 %v292_v38  ;;  %1005 = vmatpush1.msra.mxu1 %v308_v39  ;;  %v284_v3 = vld [vmem:[%s4178_s1 + $0x770] sm:$0xff]  ;;  %v281_v46 = vld [vmem:[%s4178_s1 + $0x758] sm:$0xff] }
  0xb4   :  { %937 = vmatprep.subr.mxu0 %v289_v40  ;;  %1006 = vmatprep.subr.mxu1 %v305_v41  ;;  %v428_v45 = vld [vmem:[%s4178_s1 + $0xbf0] sm:$0xff]  ;;  %v425_v47 = vld [vmem:[%s4178_s1 + $0xbd8] sm:$0xff] }
  0xb5   :  { %938 = vmatpush2.msra.mxu0 %v288_v42  ;;  %1007 = vmatpush1.msra.mxu1 %v304_v43  ;;  %v280_v48 = vld [vmem:[%s4178_s1 + $0x750] sm:$0xff]  ;;  %v277_v50 = vld [vmem:[%s4178_s1 + $0x738] sm:$0xff]  ;;  %v2205_v42 = vld [vmem:[%s4177_s0 + $0x40] sm:$0xff] }
  0xb6   :  { %939 = vmatprep.subr.mxu0 %v285_v0  ;;  %1008 = vmatprep.subr.mxu1 %v429_v44  ;;  %v424_v49 = vld [vmem:[%s4178_s1 + $0xbd0] sm:$0xff]  ;;  %v421_v51 = vld [vmem:[%s4178_s1 + $0xbb8] sm:$0xff] }
  0xb7   :  { %940 = vmatpush2.msra.mxu0 %v284_v3  ;;  %1009 = vmatpush2.msra.mxu1 %v428_v45  ;;  %v276_v52 = vld [vmem:[%s4178_s1 + $0x730] sm:$0xff]  ;;  %v273_v54 = vld [vmem:[%s4178_s1 + $0x718] sm:$0xff] }
  0xb8   :  { %941 = vmatprep.subr.mxu0 %v281_v46  ;;  %1010 = vmatprep.subr.mxu1 %v425_v47  ;;  %v420_v53 = vld [vmem:[%s4178_s1 + $0xbb0] sm:$0xff]  ;;  %v417_v55 = vld [vmem:[%s4178_s1 + $0xb98] sm:$0xff] }
  0xb9   :  { %942 = vmatpush2.msra.mxu0 %v280_v48  ;;  %1011 = vmatpush2.msra.mxu1 %v424_v49  ;;  %v272_v56 = vld [vmem:[%s4178_s1 + $0x710] sm:$0xff]  ;;  %v269_v58 = vld [vmem:[%s4178_s1 + $0x6f8] sm:$0xff] }
  0xba   :  { %943 = vmatprep.subr.mxu0 %v277_v50  ;;  %1012 = vmatprep.subr.mxu1 %v421_v51  ;;  %v416_v57 = vld [vmem:[%s4178_s1 + $0xb90] sm:$0xff]  ;;  %v413_v59 = vld [vmem:[%s4178_s1 + $0xb78] sm:$0xff]  ;;  %v2208_v51 = vld [vmem:[%s4177_s0 + $0x48] sm:$0xff] }
  0xbb   :  { %944 = vmatpush2.msra.mxu0 %v276_v52  ;;  %1013 = vmatpush2.msra.mxu1 %v420_v53  ;;  %v268_v60 = vld [vmem:[%s4178_s1 + $0x6f0] sm:$0xff]  ;;  %v265_v62 = vld [vmem:[%s4178_s1 + $0x6d8] sm:$0xff] }
  0xbc   :  { %945 = vmatprep.subr.mxu0 %v273_v54  ;;  %1014 = vmatprep.subr.mxu1 %v417_v55  ;;  %v412_v61 = vld [vmem:[%s4178_s1 + $0xb70] sm:$0xff]  ;;  %v409_v63 = vld [vmem:[%s4178_s1 + $0xb58] sm:$0xff] }
  0xbd   :  { %946 = vmatpush2.msra.mxu0 %v272_v56  ;;  %1015 = vmatpush2.msra.mxu1 %v416_v57  ;;  %v264_v1 = vld [vmem:[%s4178_s1 + $0x6d0] sm:$0xff]  ;;  %v261_v4 = vld [vmem:[%s4178_s1 + $0x6b8] sm:$0xff]  ;;  %v491_v57 = vld [vmem:[%s4180_s3 + $0x160] sm:$0xff] }
  0xbe   :  { %947 = vmatprep.subr.mxu0 %v269_v58  ;;  %1016 = vmatprep.subr.mxu1 %v413_v59  ;;  %v408_v2 = vld [vmem:[%s4178_s1 + $0xb50] sm:$0xff]  ;;  %v405_v5 = vld [vmem:[%s4178_s1 + $0xb38] sm:$0xff]  ;;  %v476_v58 = vld [vmem:[%s4180_s3 + $0xe8] sm:$0xff] }
  0xbf   :  { %948 = vmatpush2.msra.mxu0 %v268_v60  ;;  %1017 = vmatpush2.msra.mxu1 %v412_v61  ;;  %v260_v6 = vld [vmem:[%s4178_s1 + $0x6b0] sm:$0xff]  ;;  %v257_v8 = vld [vmem:[%s4178_s1 + $0x698] sm:$0xff]  ;;  %v460_v59 = vld [vmem:[%s4180_s3 + $0x68] sm:$0xff] }
  0xc0   :  { %949 = vmatprep.subr.mxu0 %v265_v62  ;;  %1018 = vmatprep.subr.mxu1 %v409_v63  ;;  %v404_v7 = vld [vmem:[%s4178_s1 + $0xb30] sm:$0xff]  ;;  %v401_v9 = vld [vmem:[%s4178_s1 + $0xb18] sm:$0xff]  ;;  %v475_v61 = vld [vmem:[%s4180_s3 + $0xe0] sm:$0xff] }
  0xc1   :  { %950 = vmatpush2.msra.mxu0 %v264_v1  ;;  %1019 = vmatpush2.msra.mxu1 %v408_v2  ;;  %v256_v10 = vld [vmem:[%s4178_s1 + $0x690] sm:$0xff]  ;;  %v253_v12 = vld [vmem:[%s4178_s1 + $0x678] sm:$0xff]  ;;  %v459_v62 = vld [vmem:[%s4180_s3 + $0x60] sm:$0xff] }
  0xc2   :  { %951 = vmatprep.subr.mxu0 %v261_v4  ;;  %1020 = vmatprep.subr.mxu1 %v405_v5  ;;  %v400_v11 = vld [vmem:[%s4178_s1 + $0xb10] sm:$0xff]  ;;  %v397_v13 = vld [vmem:[%s4178_s1 + $0xaf8] sm:$0xff]  ;;  %v488_v4 = vld [vmem:[%s4180_s3 + $0x148] sm:$0xff] }
  0xc3   :  { %952 = vmatpush2.msra.mxu0 %v260_v6  ;;  %1021 = vmatpush2.msra.mxu1 %v404_v7  ;;  %v252_v14 = vld [vmem:[%s4178_s1 + $0x670] sm:$0xff]  ;;  %v249_v18 = vld [vmem:[%s4178_s1 + $0x658] sm:$0xff]  ;;  %v487_v7 = vld [vmem:[%s4180_s3 + $0x140] sm:$0xff] }
  0xc4   :  { %953 = vmatprep.subr.mxu0 %v257_v8  ;;  %1022 = vmatprep.subr.mxu1 %v401_v9  ;;  %v396_v16 = vld [vmem:[%s4178_s1 + $0xaf0] sm:$0xff]  ;;  %v393_v19 = vld [vmem:[%s4178_s1 + $0xad8] sm:$0xff]  ;;  %v472_v8 = vld [vmem:[%s4180_s3 + $0xc8] sm:$0xff] }
  0xc5   :  { %954 = vmatpush2.msra.mxu0 %v256_v10  ;;  %1023 = vmatpush2.msra.mxu1 %v400_v11  ;;  %v248_v20 = vld [vmem:[%s4178_s1 + $0x650] sm:$0xff]  ;;  %v245_v22 = vld [vmem:[%s4178_s1 + $0x638] sm:$0xff]  ;;  %v456_v9 = vld [vmem:[%s4180_s3 + $0x48] sm:$0xff] }
  0xc6   :  { %955 = vmatprep.subr.mxu0 %v253_v12  ;;  %1024 = vmatprep.subr.mxu1 %v397_v13  ;;  %v392_v21 = vld [vmem:[%s4178_s1 + $0xad0] sm:$0xff]  ;;  %v389_v23 = vld [vmem:[%s4178_s1 + $0xab8] sm:$0xff]  ;;  %v471_v11 = vld [vmem:[%s4180_s3 + $0xc0] sm:$0xff] }
  0xc7   :  { %956 = vmatpush2.msra.mxu0 %v252_v14  ;;  %1025 = vmatpush2.msra.mxu1 %v396_v16  ;;  %v244_v26 = vld [vmem:[%s4178_s1 + $0x630] sm:$0xff]  ;;  %v241_v29 = vld [vmem:[%s4178_s1 + $0x618] sm:$0xff]  ;;  %v455_v12 = vld [vmem:[%s4180_s3 + $0x40] sm:$0xff] }
  0xc8   :  { %957 = vmatprep.subr.mxu0 %v249_v18  ;;  %1026 = vmatprep.subr.mxu1 %v393_v19  ;;  %v388_v27 = vld [vmem:[%s4178_s1 + $0xab0] sm:$0xff]  ;;  %v385_v31 = vld [vmem:[%s4178_s1 + $0xa98] sm:$0xff]  ;;  %v484_v18 = vld [vmem:[%s4180_s3 + $0x128] sm:$0xff] }
  0xc9   :  { %958 = vmatpush2.msra.mxu0 %v248_v20  ;;  %1027 = vmatpush2.msra.mxu1 %v392_v21  ;;  %v240_v32 = vld [vmem:[%s4178_s1 + $0x610] sm:$0xff]  ;;  %v381_v34 = vld [vmem:[%s4178_s1 + $0xa78] sm:$0xff]  ;;  %v483_v21 = vld [vmem:[%s4180_s3 + $0x120] sm:$0xff] }
  0xca   :  { %959 = vmatprep.subr.mxu0 %v245_v22  ;;  %1028 = vmatprep.subr.mxu1 %v389_v23  ;;  %v384_v33 = vld [vmem:[%s4178_s1 + $0xa90] sm:$0xff]  ;;  %v445_v35 = vld [vmem:[%s4178_s1 + $0xc78] sm:$0xff]  ;;  %v468_v22 = vld [vmem:[%s4180_s3 + $0xa8] sm:$0xff] }
  0xcb   :  { %960 = vmatpush2.msra.mxu0 %v244_v26  ;;  %1029 = vmatpush2.msra.mxu1 %v388_v27  ;;  %v2203_v36 = vld [vmem:[%s4177_s0 + $0x18] sm:$0xff]  ;;  %v380_v37 = vld [vmem:[%s4178_s1 + $0xa70] sm:$0xff]  ;;  %v452_v23 = vld [vmem:[%s4180_s3 + $0x28] sm:$0xff] }
  0xcc   :  { %961 = vmatprep.subr.mxu0 %v241_v29  ;;  %1030 = vmatprep.subr.mxu1 %v385_v31  ;;  %v2204_v38 = vld [vmem:[%s4177_s0 + $0x10] sm:$0xff]  ;;  %v377_v40 = vld [vmem:[%s4178_s1 + $0xa58] sm:$0xff]  ;;  %v467_v27 = vld [vmem:[%s4180_s3 + $0xa0] sm:$0xff] }
  0xcd   :  { %962 = vmatpush2.msra.mxu0 %v240_v32  ;;  %963 = vmatprep.mubr.f32.mxu0 %v2203_v36  ;;  %v444_v39 = vld [vmem:[%s4178_s1 + $0xc70] sm:$0xff]  ;;  %v441_v41 = vld [vmem:[%s4178_s1 + $0xc58] sm:$0xff]  ;;  %v451_v29 = vld [vmem:[%s4180_s3 + $0x20] sm:$0xff] }
  0xce   :  { %1031 = vmatpush2.msra.mxu1 %v384_v33  ;;  %964 = vmatmul.mubr.f32.vlgmr.msra.gmra.mxu0 %v2204_v38  ;;  %v376_v43 = vld [vmem:[%s4178_s1 + $0xa50] sm:$0xff]  ;;  %v2206_v0 = vld [vmem:[%s4177_s0 + $0x38] sm:$0xff]  ;;  %v464_v38 = vld [vmem:[%s4180_s3 + $0x88] sm:$0xff] }
  0xcf   :  { %1032 = vmatprep.subr.mxu1 %v381_v34  ;;  %1077 = vmatprep.subr.mxu0 %v445_v35  ;;  %v440_v44 = vld [vmem:[%s4178_s1 + $0xc50] sm:$0xff]  ;;  %v373_v3 = vld [vmem:[%s4178_s1 + $0xa38] sm:$0xff]  ;;  %v480_v34 = vld [vmem:[%s4180_s3 + $0x108] sm:$0xff] }
  0xd0   :  { %892 = vmatprep.mubr.f32.mxu1 %v2205_v42  ;;  %1033 = vmatpush2.msra.mxu1 %v380_v37  ;;  %v437_v45 = vld [vmem:[%s4178_s1 + $0xc38] sm:$0xff]  ;;  %v2207_v46 = vld [vmem:[%s4177_s0 + $0x50] sm:$0xff]  ;;  %v479_v37 = vld [vmem:[%s4180_s3 + $0x100] sm:$0xff] }
  0xd1   :  { %1078 = vmatpush1.msra.mxu0 %v444_v39  ;;  %893 = vmatmul.mubr.f32.gmra.mxu1 %v2206_v0  ;;  %v372_v47 = vld [vmem:[%s4178_s1 + $0xa30] sm:$0xff]  ;;  %v369_v49 = vld [vmem:[%s4178_s1 + $0xa18] sm:$0xff]  ;;  %v448_v39 = vld [vmem:[%s4180_s3 + $0x8] sm:$0xff] }
  0xd2   :  { %1034 = vmatprep.subr.mxu1 %v377_v40  ;;  %1079 = vmatprep.subr.mxu0 %v441_v41  ;;  %v436_v48 = vld [vmem:[%s4178_s1 + $0xc30] sm:$0xff]  ;;  %v433_v50 = vld [vmem:[%s4178_s1 + $0xc18] sm:$0xff]  ;;  %v496_v40 = vld [vmem:[%s4180_s3 + $0x188] sm:$0xff] }
  0xd3   :  { %969 = vmatprep.mubr.f32.mxu0 %v2207_v46  ;;  %1035 = vmatpush2.msra.mxu1 %v376_v43  ;;  %v368_v52 = vld [vmem:[%s4178_s1 + $0xa10] sm:$0xff]  ;;  %v490_v60 = vld [vmem:[%s4180_s3 + $0x158] sm:$0xff]  ;;  %v463_v41 = vld [vmem:[%s4180_s3 + $0x80] sm:$0xff] }
  0xd4   :  { %1080 = vmatpush1.msra.mxu0 %v440_v44  ;;  %1036 = vmatprep.subr.mxu1 %v373_v3  ;;  %v432_v53 = vld [vmem:[%s4178_s1 + $0xc10] sm:$0xff]  ;;  %v474_v1 = vld [vmem:[%s4180_s3 + $0xd8] sm:$0xff]  ;;  %v447_v42 = vld [vmem:[%s4180_s3] sm:$0xff] }
  0xd5   :  { %970 = vmatmul.mubr.f32.gmra.mxu0 %v2208_v51  ;;  %1081 = vmatprep.subr.mxu0 %v437_v45  ;;  %v2209_v54 = vld [vmem:[%s4177_s0 + $0x30] sm:$0xff]  ;;  %v458_v2 = vld [vmem:[%s4180_s3 + $0x58] sm:$0xff]  ;;  %v495_v43 = vld [vmem:[%s4180_s3 + $0x180] sm:$0xff] }
  0xd6   :  { %1037 = vmatpush2.msra.mxu1 %v372_v47  ;;  %1082 = vmatpush1.msra.mxu0 %v436_v48  ;;  %v477_v55 = vld [vmem:[%s4180_s3 + $0xf0] sm:$0xff]  ;;  %v486_v10 = vld [vmem:[%s4180_s3 + $0x138] sm:$0xff] }
  0xd7   :  { %1038 = vmatprep.subr.mxu1 %v369_v49  ;;  %1083 = vmatprep.subr.mxu0 %v433_v50  ;;  %v461_v56 = vld [vmem:[%s4180_s3 + $0x70] sm:$0xff]  ;;  %v470_v14 = vld [vmem:[%s4180_s3 + $0xb8] sm:$0xff] }
  0xd8   :  { %1039 = vmatpush2.msra.mxu1 %v368_v52  ;;  %1040 = vmatprep.mubr.f32.mxu1 %v3110_v15  ;;  %v494_v15 = vld [vmem:[%s4180_s3 + $0x178] sm:$0xff]  ;;  %v489_v63 = vld [vmem:[%s4180_s3 + $0x150] sm:$0xff] }
  0xd9   :  { %1084 = vmatpush1.msra.mxu0 %v432_v53  ;;  %1117 = vmatprep.mubr.f32.mxu0 %v2254_v30  ;;  %v473_v5 = vld [vmem:[%s4180_s3 + $0xd0] sm:$0xff]  ;;  %v454_v16 = vld [vmem:[%s4180_s3 + $0x38] sm:$0xff] }
  0xda   :  { %1041 = vmatmul.mubr.f32.vlgmr.msra.gmra.mxu1 %v3118_v17  ;;  %2051 = vmatmul.mubr.msk.f32.vlgmr.msra.gmra.mxu0 %vm507_vm0, %v2209_v54  ;;  %v493_v17 = vld [vmem:[%s4180_s3 + $0x170] sm:$0xff]  ;;  %v482_v26 = vld [vmem:[%s4180_s3 + $0x118] sm:$0xff] }
  0xdb   :  { %1046 = vmatprep.mubr.f32.mxu1 %v3143_v24  ;;  %1123 = vmatprep.mubr.f32.mxu0 %v2254_v30  ;;  %v478_v24 = vld [vmem:[%s4180_s3 + $0xf8] sm:$0xff]  ;;  %v457_v6 = vld [vmem:[%s4180_s3 + $0x50] sm:$0xff] }
  0xdc   :  { %1615 = vmatprep.subr.mxu1 %v2254_v30  ;;  %2064 = vmatprep.subr.mxu0 %v478_v24  ;;  %v485_v13 = vld [vmem:[%s4180_s3 + $0x130] sm:$0xff]  ;;  %v466_v32 = vld [vmem:[%s4180_s3 + $0x98] sm:$0xff] }
  0xdd   :  { %1616 = vmatpush1.msra.mxu1 %v494_v15  ;;  %v469_v19 = vld [vmem:[%s4180_s3 + $0xb0] sm:$0xff]  ;;  %v450_v33 = vld [vmem:[%s4180_s3 + $0x18] sm:$0xff] }
  0xde   :  { %1047 = vmatmul.mubr.f32.gmra.mxu1 %v3160_v28  ;;  %2052 = vmatmul.mubr.msk.f32.gmra.mxu0 %vm507_vm0, %v3148_v25  ;;  %v462_v25 = vld [vmem:[%s4180_s3 + $0x78] sm:$0xff]  ;;  %v492_v28 = vld [vmem:[%s4180_s3 + $0x168] sm:$0xff]  ;;  %v453_v20 = vld [vmem:[%s4180_s3 + $0x30] sm:$0xff] }
  0xdf   :  { %1617 = vmatprep.subr.mxu1 %v2254_v30  ;;  %2065 = vmatpush3.msra.mxu0 %v462_v25  ;;  %v481_v31 = vld [vmem:[%s4180_s3 + $0x110] sm:$0xff] }
  0xe0   :  { %1618 = vmatpush1.msra.mxu1 %v493_v17  ;;  %2066 = vmatprep.subr.mxu0 %v477_v55  ;;  %v465_v35 = vld [vmem:[%s4180_s3 + $0x90] sm:$0xff] }
  0xe1   :  { %1619 = vmatprep.subr.mxu1 %v2254_v30  ;;  %2067 = vmatpush3.msra.mxu0 %v461_v56  ;;  %v449_v36 = vld [vmem:[%s4180_s3 + $0x10] sm:$0xff] }
  0xe2   :  { %1620 = vmatpush1.msra.mxu1 %v492_v28  ;;  %2068 = vmatprep.subr.mxu0 %v476_v58 }
  0xe3   :  { %1621 = vmatprep.subr.mxu1 %v2254_v30  ;;  %2069 = vmatpush3.msra.mxu0 %v460_v59 }
  0xe4   :  { %1622 = vmatpush1.msra.mxu1 %v491_v57  ;;  %2070 = vmatprep.subr.mxu0 %v475_v61 }
  0xe5   :  { %1623 = vmatprep.subr.mxu1 %v2254_v30  ;;  %2071 = vmatpush3.msra.mxu0 %v459_v62  ;;  %v2255_v62 = vmov 1966171168  }
  0xe6   :  { %1624 = vmatpush1.msra.mxu1 %v490_v60  ;;  %2072 = vmatprep.subr.mxu0 %v474_v1  ;;  %v1141_v1 = vlaneseq }
  0xe7   :  { %1625 = vmatprep.subr.mxu1 %v2254_v30  ;;  %2073 = vmatpush3.msra.mxu0 %v458_v2 }
  0xe8   :  { %1626 = vmatpush1.msra.mxu1 %v489_v63  ;;  %2074 = vmatprep.subr.mxu0 %v473_v5  ;;  %v1139_v63 = vunpack.c.l.s4 %v2255_v62 }
  0xe9   :  { %1627 = vmatprep.subr.mxu1 %v2254_v30  ;;  %2075 = vmatpush3.msra.mxu0 %v457_v6 }
  0xea   :  { %1628 = vmatpush1.msra.mxu1 %v488_v4  ;;  %2076 = vmatprep.subr.mxu0 %v472_v8 }
  0xeb   :  { %1629 = vmatprep.subr.mxu1 %v2254_v30  ;;  %2077 = vmatpush3.msra.mxu0 %v456_v9 }
  0xec   :  { %1630 = vmatpush1.msra.mxu1 %v487_v7  ;;  %2078 = vmatprep.subr.mxu0 %v471_v11  ;;  %v1140_v11 = vunpack.c.0.s8 %v1139_v63 }
  0xed   :  { %1631 = vmatprep.subr.mxu1 %v2254_v30  ;;  %2079 = vmatpush3.msra.mxu0 %v455_v12  ;;  %v1142_v12 = vshrl.u32 %v1141_v1, 7 }
  0xee   :  { %1632 = vmatpush1.msra.mxu1 %v486_v10  ;;  %2080 = vmatprep.subr.mxu0 %v470_v14 }
  0xef   :  { %1633 = vmatprep.subr.mxu1 %v2254_v30  ;;  %2081 = vmatpush3.msra.mxu0 %v454_v16 }
  0xf0   :  { %1634 = vmatpush1.msra.mxu1 %v485_v13  ;;  %2082 = vmatprep.subr.mxu0 %v469_v19 }
  0xf1   :  { %1635 = vmatprep.subr.mxu1 %v2254_v30  ;;  %2083 = vmatpush3.msra.mxu0 %v453_v20 }
  0xf2   :  { %1636 = vmatpush1.msra.mxu1 %v484_v18  ;;  %2084 = vmatprep.subr.mxu0 %v468_v22 }
  0xf3   :  { %1637 = vmatprep.subr.mxu1 %v2254_v30  ;;  %2085 = vmatpush3.msra.mxu0 %v452_v23  ;;  %v3779_v23 = vsub.s32 %v1140_v11, %v1142_v12 }
  0xf4   :  { %1638 = vmatpush1.msra.mxu1 %v483_v21  ;;  %2086 = vmatprep.subr.mxu0 %v467_v27 }
  0xf5   :  { %1639 = vmatprep.subr.mxu1 %v2254_v30  ;;  %2087 = vmatpush3.msra.mxu0 %v451_v29 }
  0xf6   :  { %1640 = vmatpush1.msra.mxu1 %v482_v26  ;;  %2088 = vmatprep.subr.mxu0 %v466_v32 }
  0xf7   :  { %1641 = vmatprep.subr.mxu1 %v2254_v30  ;;  %2089 = vmatpush3.msra.mxu0 %v450_v33 }
  0xf8   :  { %1642 = vmatpush1.msra.mxu1 %v481_v31  ;;  %2090 = vmatprep.subr.mxu0 %v465_v35 }
  0xf9   :  { %1643 = vmatprep.subr.mxu1 %v2254_v30  ;;  %2091 = vmatpush3.msra.mxu0 %v449_v36 }
  0xfa   :  { %1644 = vmatpush1.msra.mxu1 %v480_v34  ;;  %2092 = vmatprep.subr.mxu0 %v464_v38  ;;  %v3783_v38 = vsub.s32 3, %v1142_v12 }
  0xfb   :  { %1645 = vmatprep.subr.mxu1 %v2254_v30  ;;  %2093 = vmatpush3.msra.mxu0 %v448_v39 }
  0xfc   :  { %1646 = vmatpush1.msra.mxu1 %v479_v37  ;;  %2094 = vmatprep.subr.mxu0 %v463_v41  ;;  %v3781_v37 = vsub.s32 1, %v1142_v12 }
  0xfd   :  { %1675 = vmatprep.subr.mxu1 %v2254_v30  ;;  %2095 = vmatpush3.msra.mxu0 %v447_v42 }
  0xfe   :  { %1676 = vmatpush2.msra.mxu1 %v496_v40  ;;  %2129 = vmatprep.subr.mxu0 %v2254_v30 }
  0xff   :  { %1677 = vmatprep.subr.mxu1 %v2254_v30 }
 0x100   :  { %1678 = vmatpush2.msra.mxu1 %v495_v43  ;;  %v446_v43 = vld [vmem:[%s4179_s2] sm:$0xf] }
 0x105   :  { %v580_v44 = vpop.f32.mrf.mxu0 }
 0x106   :  { %v657_v0 = vpop.f32.mrf.mxu1 }
 0x107   :  { %v582_v45 = vpop.f32.mrf.mxu0  ;;  %v658_v33 = vadd.f32 %v657_v0, %v580_v44 }
 0x108   :  { %v659_v3 = vpop.f32.mrf.mxu1 }
 0x109   :  { %v660_v34 = vadd.f32 %v659_v3, %v582_v45 }
 0x10b   :  { %v586_v47 = vpop.f32.mrf.mxu0 }
 0x10c   :  { %v663_v46 = vpop.f32.mrf.mxu1 }
 0x10d   :  { %v588_v49 = vpop.f32.mrf.mxu0  ;;  %v664_v5 = vadd.f32 %v663_v46, %v586_v47 }
 0x10e   :  { %v665_v48 = vpop.f32.mrf.mxu1 }
 0x10f   :  { %v666_v61 = vadd.f32 %v665_v48, %v588_v49  ;;  %v3792_v48 = vsub.s32 0, %v1142_v12  ;;  %v3794_v49 = vsub.s32 2, %v1142_v12 }
 0x111   :  { %v3775_v50 = vpop.f32.mrf.mxu1 }
 0x113   :  { %v3777_v52 = vpop.f32.mrf.mxu1 }
 0x14a   :  { %v734_v51 = vpop.f32.mrf.mxu0 }
 0x14b   :  { %v735_v39 = vadd.f32 %v734_v51, %v658_v33 }
 0x14c   :  { %v736_v53 = vpop.f32.mrf.mxu0 }
 0x14d   :  { %v737_v40 = vadd.f32 %v736_v53, %v660_v34 }
 0x14f   :  { %v817_v54 = vpop.f32.mrf.mxu1 }
 0x150   :  { %v740_v15 = vpop.f32.mrf.mxu0 }
 0x151   :  { %v819_v17 = vpop.f32.mrf.mxu1  ;;  %v741_v9 = vadd.f32 %v740_v15, %v664_v5  ;;  %v3797_v15 = vrot.slane %v446_v43, %v3781_v37 }
 0x152   :  { %v742_v24 = vpop.f32.mrf.mxu0 }
 0x153   :  { %v743_v6 = vadd.f32 %v742_v24, %v666_v61  ;;  %v818_v21 = vadd.f32 %v817_v54, %v741_v9  ;;  %v3803_v24 = vrot.slane %v446_v43, %v3792_v48 }
 0x155   :  { %v888_v25 = vpop.f32.mrf.mxu1  ;;  %v820_v16 = vadd.f32 %v819_v17, %v743_v6  ;;  %v3800_v17 = vrot.slane %v446_v43, %v3783_v38 }
 0x157   :  { %v890_v56 = vpop.f32.mrf.mxu1  ;;  %v1134_v27 = vcombine.low %v818_v21, %v820_v16  ;;  %v1135_v29 = vcombine.high %v818_v21, %v820_v16 }
 0x159   :  { %v1144_v46 = vrot.slane %v1134_v27, %v3779_v23  ;;  %v1151_v47 = vrot.slane %v1135_v29, %v3779_v23 }
 0x18e   :  { %v965_v28 = vpop.f32.mrf.mxu0 }
 0x18f   :  { %v966_v41 = vadd.f32 %v965_v28, %v888_v25  ;;  %v3806_v25 = vrot.slane %v446_v43, %v3794_v49  ;;  %v3809_v28 = vadd.f32 %v3775_v50, %v735_v39 }
 0x190   :  { %v967_v55 = vpop.f32.mrf.mxu0 }
 0x191   :  { %v894_v57 = vpop.f32.mrf.mxu1  ;;  %v968_v42 = vadd.f32 %v967_v55, %v890_v56  ;;  %v3812_v55 = vadd.f32 %v3777_v52, %v737_v40 }
 0x193   :  { %v896_v60 = vpop.f32.mrf.mxu1 }
 0x195   :  { %v971_v58 = vpop.f32.mrf.mxu0 }
 0x196   :  { %v972_v10 = vadd.f32 %v971_v58, %v894_v57 }
 0x197   :  { %v973_v59 = vpop.f32.mrf.mxu0 }
 0x198   :  { %v974_v18 = vadd.f32 %v973_v59, %v896_v60 }
 0x19a   :  { %v1042_v2 = vpop.f32.mrf.mxu1  ;;  %v1119_v4 = vpop.f32.mrf.mxu0 }
 0x19b   :  { %v1043_v3 = vadd.f32 %v1042_v2, %v966_v41 }
 0x19c   :  { %v1044_v7 = vpop.f32.mrf.mxu1  ;;  %v1121_v8 = vpop.f32.mrf.mxu0 }
 0x19d   :  { %v1045_v45 = vadd.f32 %v1044_v7, %v968_v42  ;;  %v3816_v58 = vadd.f32 %v1119_v4, %v1043_v3 }
 0x19e   :  { %v1048_v13 = vpop.f32.mrf.mxu1  ;;  %v1125_v14 = vpop.f32.mrf.mxu0 }
 0x19f   :  { %v1049_v19 = vadd.f32 %v1048_v13, %v972_v10  ;;  %v3818_v59 = vadd.f32 %v1121_v8, %v1045_v45 }
 0x1a0   :  { %v1050_v20 = vpop.f32.mrf.mxu1  ;;  %v1127_v26 = vpop.f32.mrf.mxu0 }
 0x1a1   :  { %v1051_v22 = vadd.f32 %v1050_v20, %v974_v18  ;;  %v1126_v31 = vadd.f32 %v1125_v14, %v1049_v19 }
 0x1a3   :  { %v1128_v32 = vadd.f32 %v1127_v26, %v1051_v22 }
 0x1a5   :  { %v1136_v35 = vcombine.low %v1126_v31, %v1128_v32  ;;  %v1137_v36 = vcombine.high %v1126_v31, %v1128_v32 }
 0x1a7   :  { %v1158_v0 = vrot.slane %v1136_v35, %v3779_v23  ;;  %v1165_v44 = vrot.slane %v1137_v36, %v3779_v23 }
 0x1a9   :  { %v1166_v51 = vcombine.low %v1144_v46, %v1158_v0  ;;  %v1167_v53 = vcombine.high %v1144_v46, %v1158_v0  ;;  %v1168_v54 = vcombine.low %v1151_v47, %v1165_v44  ;;  %v1169_v60 = vcombine.high %v1151_v47, %v1165_v44 }
 0x1ab   :  { %v1176_v56 = vrot.slane %v1166_v51, %v3779_v23  ;;  %v1190_v57 = vrot.slane %v1167_v53, %v3779_v23  ;;  %v3821_v61 = vrot.slane %v1168_v54, %v3779_v23  ;;  %v3848_v33 = vrot.slane %v1169_v60, %v3779_v23 }
 0x1ad   :  { %v1209_v62 = vrot.slane %v1176_v56, %v3781_v37  ;;  %v1217_v50 = vrot.slane %v1176_v56, %v3783_v38  ;;  %v1205_v63 = vrot.slane %v1176_v56, %v3792_v48  ;;  %v1213_v52 = vrot.slane %v1176_v56, %v3794_v49 }
 0x1ae   :  { %v1225_v1 = vrot.slane %v1190_v57, %v3781_v37  ;;  %v1233_v2 = vrot.slane %v1190_v57, %v3783_v38  ;;  %v1221_v4 = vrot.slane %v1190_v57, %v3792_v48  ;;  %v1229_v5 = vrot.slane %v1190_v57, %v3794_v49 }
 0x1af   :  { %v1363_v6 = vadd.f32 %v1209_v62, %v3812_v55  ;;  %v1365_v7 = vadd.f32 %v1217_v50, %v3818_v59  ;;  %v1362_v8 = vadd.f32 %v1205_v63, %v3809_v28  ;;  %v1364_v9 = vadd.f32 %v1213_v52, %v3816_v58 }
 0x1b0   :  { %v1367_v10 = vadd.f32 %v1225_v1, %v3812_v55  ;;  %v1369_v11 = vadd.f32 %v1233_v2, %v3818_v59  ;;  %v1366_v12 = vadd.f32 %v1221_v4, %v3809_v28  ;;  %v1368_v13 = vadd.f32 %v1229_v5, %v3816_v58 }
 0x1b1   :  { %v1416_v14 = vadd.f32 %v3797_v15, %v1363_v6  ;;  %v1418_v16 = vadd.f32 %v3800_v17, %v1365_v7  ;;  %v1415_v18 = vadd.f32 %v3803_v24, %v1362_v8  ;;  %v1417_v19 = vadd.f32 %v3806_v25, %v1364_v9 }
 0x1b2   :  { %v1420_v20 = vadd.f32 %v3797_v15, %v1367_v10  ;;  %v1422_v21 = vadd.f32 %v3800_v17, %v1369_v11  ;;  %v1419_v22 = vadd.f32 %v3803_v24, %v1366_v12  ;;  %v1421_v26 = vadd.f32 %v3806_v25, %v1368_v13 }
 0x1b3   :  { %v1448_v27 = vmax.f32 %v1416_v14, 0.0  ;;  %v1450_v29 = vmax.f32 %v1418_v16, 0.0  ;;  %v1447_v31 = vmax.f32 %v1415_v18, 0.0  ;;  %v1449_v32 = vmax.f32 %v1417_v19, 0.0 }
 0x1b4   :  { %v1452_v34 = vmax.f32 %v1420_v20, 0.0  ;;  %v1454_v35 = vmax.f32 %v1422_v21, 0.0  ;;  %v1198_v36 = vcombine.high %v1176_v56, %v1176_v56  ;;  %v1200_v39 = vcombine.high %v1190_v57, %v1190_v57 }
 0x1b5   :  { %1574 = vmatprep.mubr.f32.mxu0 %v1448_v27  ;;  %2054 = vmatprep.mubr.msk.f32.mxu1 %vm1485_vm1, %v1450_v29  ;;  %v1273_v40 = vrot.slane %v3821_v61, %v3781_v37  ;;  %v1451_v41 = vmax.f32 %v1419_v22, 0.0  ;;  %v1281_v42 = vrot.slane %v3821_v61, %v3783_v38  ;;  %v1269_v23 = vrot.slane %v3821_v61, %v3792_v48 }
 0x1b6   :  { %1575 = vmatmul.mubr.f32.vlgmr.msra.gmra.mxu0 %v1447_v31  ;;  %1680 = vmatmul.mubr.f32.vlgmr.msra.gmra.mxu1 %v1449_v32  ;;  %v1277_v43 = vrot.slane %v3821_v61, %v3794_v49  ;;  %v1453_v46 = vmax.f32 %v1421_v26, 0.0  ;;  %v1241_v47 = vrot.slane %v1198_v36, %v3781_v37  ;;  %v1249_v0 = vrot.slane %v1198_v36, %v3783_v38 }
 0x1b7   :  { %1579 = vmatprep.mubr.f32.mxu0 %v1452_v34  ;;  %2055 = vmatprep.mubr.msk.f32.mxu1 %vm1485_vm1, %v1454_v35  ;;  %v1237_v44 = vrot.slane %v1198_v36, %v3792_v48  ;;  %v1245_v3 = vrot.slane %v1198_v36, %v3794_v49  ;;  %v1257_v45 = vrot.slane %v1200_v39, %v3781_v37 }
 0x1b8   :  { %v1265_v51 = vrot.slane %v1200_v39, %v3783_v38  ;;  %v1253_v53 = vrot.slane %v1200_v39, %v3792_v48  ;;  %v1371_v54 = vadd.f32 %v1241_v47, %v3812_v55  ;;  %v1373_v56 = vadd.f32 %v1249_v0, %v3818_v59 }
 0x1b9   :  { %v1370_v57 = vadd.f32 %v1237_v44, %v3809_v28  ;;  %v1261_v60 = vrot.slane %v1200_v39, %v3794_v49  ;;  %v1372_v62 = vadd.f32 %v1245_v3, %v3816_v58  ;;  %v1375_v50 = vadd.f32 %v1257_v45, %v3812_v55 }
 0x1ba   :  { %1580 = vmatmul.mubr.f32.gmra.mxu0 %v1451_v41  ;;  %1685 = vmatmul.mubr.f32.gmra.mxu1 %v1453_v46  ;;  %v1377_v63 = vadd.f32 %v1265_v51, %v3818_v59  ;;  %v1424_v52 = vadd.f32 %v3797_v15, %v1371_v54  ;;  %v1426_v1 = vadd.f32 %v3800_v17, %v1373_v56 }
 0x1bb   :  { %v1423_v2 = vadd.f32 %v3803_v24, %v1370_v57  ;;  %v1374_v4 = vadd.f32 %v1253_v53, %v3809_v28  ;;  %v1425_v5 = vadd.f32 %v3806_v25, %v1372_v62  ;;  %v1428_v6 = vadd.f32 %v3797_v15, %v1375_v50 }
 0x1bc   :  { %v1430_v7 = vadd.f32 %v3800_v17, %v1377_v63  ;;  %v1376_v8 = vadd.f32 %v1261_v60, %v3816_v58  ;;  %v1456_v9 = vmax.f32 %v1424_v52, 0.0  ;;  %v1458_v10 = vmax.f32 %v1426_v1, 0.0 }
 0x1bd   :  { %v1427_v11 = vadd.f32 %v3803_v24, %v1374_v4  ;;  %v1455_v12 = vmax.f32 %v1423_v2, 0.0  ;;  %v1457_v13 = vmax.f32 %v1425_v5, 0.0  ;;  %v1460_v14 = vmax.f32 %v1428_v6, 0.0 }
 0x1be   :  { %v1429_v16 = vadd.f32 %v3806_v25, %v1376_v8  ;;  %1584 = vmatprep.mubr.f32.mxu0 %v1456_v9  ;;  %2056 = vmatprep.mubr.msk.f32.mxu1 %vm1485_vm1, %v1458_v10  ;;  %v1462_v18 = vmax.f32 %v1430_v7, 0.0  ;;  %v1379_v19 = vadd.f32 %v1273_v40, %v3812_v55  ;;  %v1381_v20 = vadd.f32 %v1281_v42, %v3818_v59 }
 0x1bf   :  { %v1378_v21 = vadd.f32 %v1269_v23, %v3809_v28  ;;  %1585 = vmatmul.mubr.f32.gmra.mxu0 %v1455_v12  ;;  %1690 = vmatmul.mubr.f32.gmra.mxu1 %v1457_v13  ;;  %v1459_v22 = vmax.f32 %v1427_v11, 0.0  ;;  %v1380_v26 = vadd.f32 %v1277_v43, %v3816_v58  ;;  %v1289_v27 = vrot.slane %v3848_v33, %v3781_v37 }
 0x1c0   :  { %v1297_v29 = vrot.slane %v3848_v33, %v3783_v38  ;;  %1589 = vmatprep.mubr.f32.mxu0 %v1460_v14  ;;  %2057 = vmatprep.mubr.msk.f32.mxu1 %vm1485_vm1, %v1462_v18  ;;  %v1461_v31 = vmax.f32 %v1429_v16, 0.0  ;;  %v1432_v32 = vadd.f32 %v3797_v15, %v1379_v19  ;;  %v1434_v34 = vadd.f32 %v3800_v17, %v1381_v20 }
 0x1c1   :  { %v1431_v35 = vadd.f32 %v3803_v24, %v1378_v21  ;;  %v1433_v36 = vadd.f32 %v3806_v25, %v1380_v26  ;;  %v1383_v39 = vadd.f32 %v1289_v27, %v3812_v55  ;;  %v1285_v41 = vrot.slane %v3848_v33, %v3792_v48  ;;  %v3942_v27 = vld [vmem:[#allocation2] ss:$0 sm:$0xff] }
 0x1c2   :  { %v1385_v40 = vadd.f32 %v1297_v29, %v3818_v59  ;;  %v1464_v42 = vmax.f32 %v1432_v32, 0.0  ;;  %v1466_v23 = vmax.f32 %v1434_v34, 0.0  ;;  %v1293_v43 = vrot.slane %v3848_v33, %v3794_v49 }
 0x1c3   :  { %1590 = vmatmul.mubr.f32.gmra.mxu0 %v1459_v22  ;;  %1695 = vmatmul.mubr.f32.gmra.mxu1 %v1461_v31  ;;  %v1436_v46 = vadd.f32 %v3797_v15, %v1383_v39  ;;  %v1382_v0 = vadd.f32 %v1285_v41, %v3809_v28  ;;  %v1463_v44 = vmax.f32 %v1431_v35, 0.0  ;;  %v1199_v45 = vcombine.high %v3821_v61, %v3821_v61 }
 0x1c4   :  { %v1438_v47 = vadd.f32 %v3800_v17, %v1385_v40  ;;  %1594 = vmatprep.mubr.f32.mxu0 %v1464_v42  ;;  %2058 = vmatprep.mubr.msk.f32.mxu1 %vm1485_vm1, %v1466_v23  ;;  %v1384_v3 = vadd.f32 %v1293_v43, %v3816_v58  ;;  %v1201_v51 = vcombine.high %v3848_v33, %v3848_v33  ;;  %v1465_v53 = vmax.f32 %v1433_v36, 0.0 }
 0x1c5   :  { %v1468_v54 = vmax.f32 %v1436_v46, 0.0  ;;  %v1435_v57 = vadd.f32 %v3803_v24, %v1382_v0  ;;  %v1305_v62 = vrot.slane %v1199_v45, %v3781_v37  ;;  %v1313_v50 = vrot.slane %v1199_v45, %v3783_v38 }
 0x1c6   :  { %v1470_v56 = vmax.f32 %v1438_v47, 0.0  ;;  %v1437_v60 = vadd.f32 %v3806_v25, %v1384_v3  ;;  %v1301_v63 = vrot.slane %v1199_v45, %v3792_v48  ;;  %v1309_v61 = vrot.slane %v1199_v45, %v3794_v49 }
 0x1c7   :  { %1595 = vmatmul.mubr.f32.gmra.mxu0 %v1463_v44  ;;  %1700 = vmatmul.mubr.f32.gmra.mxu1 %v1465_v53  ;;  %v1467_v52 = vmax.f32 %v1435_v57, 0.0  ;;  %v1321_v33 = vrot.slane %v1201_v51, %v3781_v37  ;;  %v1329_v1 = vrot.slane %v1201_v51, %v3783_v38  ;;  %v1387_v4 = vadd.f32 %v1305_v62, %v3812_v55 }
 0x1c8   :  { %1599 = vmatprep.mubr.f32.mxu0 %v1468_v54  ;;  %2059 = vmatprep.mubr.msk.f32.mxu1 %vm1485_vm1, %v1470_v56  ;;  %v1469_v2 = vmax.f32 %v1437_v60, 0.0  ;;  %v1389_v5 = vadd.f32 %v1313_v50, %v3818_v59  ;;  %v1386_v6 = vadd.f32 %v1301_v63, %v3809_v28  ;;  %v1388_v7 = vadd.f32 %v1309_v61, %v3816_v58 }
 0x1c9   :  { %v1391_v8 = vadd.f32 %v1321_v33, %v3812_v55  ;;  %v1393_v9 = vadd.f32 %v1329_v1, %v3818_v59  ;;  %v1317_v37 = vrot.slane %v1201_v51, %v3792_v48  ;;  %v1440_v38 = vadd.f32 %v3797_v15, %v1387_v4 }
 0x1ca   :  { %v1442_v10 = vadd.f32 %v3800_v17, %v1389_v5  ;;  %v1439_v11 = vadd.f32 %v3803_v24, %v1386_v6  ;;  %v1325_v12 = vrot.slane %v1201_v51, %v3794_v49  ;;  %v1441_v13 = vadd.f32 %v3806_v25, %v1388_v7 }
 0x1cb   :  { %1600 = vmatmul.mubr.f32.gmra.mxu0 %v1467_v52  ;;  %1705 = vmatmul.mubr.f32.gmra.mxu1 %v1469_v2  ;;  %v1444_v14 = vadd.f32 %v3797_v15, %v1391_v8  ;;  %v1446_v55 = vadd.f32 %v3800_v17, %v1393_v9  ;;  %v1472_v16 = vmax.f32 %v1440_v38, 0.0  ;;  %v1390_v48 = vadd.f32 %v1317_v37, %v3809_v28 }
 0x1cc   :  { %v1474_v59 = vmax.f32 %v1442_v10, 0.0  ;;  %v1471_v18 = vmax.f32 %v1439_v11, 0.0  ;;  %v1473_v19 = vmax.f32 %v1441_v13, 0.0  ;;  %v1392_v20 = vadd.f32 %v1325_v12, %v3816_v58 }
 0x1cd   :  { %1604 = vmatprep.mubr.f32.mxu0 %v1472_v16  ;;  %v1476_v49 = vmax.f32 %v1444_v14, 0.0  ;;  %v1478_v21 = vmax.f32 %v1446_v55, 0.0  ;;  %v1443_v22 = vadd.f32 %v3803_v24, %v1390_v48 }
 0x1ce   :  { %2060 = vmatprep.mubr.msk.f32.mxu1 %vm1485_vm1, %v1474_v59  ;;  %v1445_v15 = vadd.f32 %v3806_v25, %v1392_v20 }
 0x1cf   :  { %1605 = vmatmul.mubr.f32.gmra.mxu0 %v1471_v18  ;;  %1710 = vmatmul.mubr.f32.gmra.mxu1 %v1473_v19  ;;  %v1475_v17 = vmax.f32 %v1443_v22, 0.0 }
 0x1d0   :  { %1609 = vmatprep.mubr.f32.mxu0 %v1476_v49  ;;  %2061 = vmatprep.mubr.msk.f32.mxu1 %vm1485_vm1, %v1478_v21  ;;  %v1477_v28 = vmax.f32 %v1445_v15, 0.0 }
 0x1d3   :  { %1610 = vmatmul.mubr.f32.gmra.mxu0 %v1475_v17  ;;  %1715 = vmatmul.mubr.f32.gmra.mxu1 %v1477_v28 }
 0x1d4   :  { %2145 = vmatprep.mubr.msk.f32.mxu0 %vm2256_vm2, %v2254_v30 }
 0x276   :  { %v2096_v26 = vpop.f32.mrf.mxu0  ;;  %v1681_v58 = vpop.f32.mrf.mxu1 }
 0x278   :  { %v2097_v29 = vpop.f32.mrf.mxu0  ;;  %v1683_v31 = vpop.f32.mrf.mxu1 }
 0x279   :  { %v2098_v24 = vadd.f32 %v2097_v29, %v2096_v26 }
 0x27a   :  { %v2099_v32 = vpop.f32.mrf.mxu0  ;;  %v1686_v34 = vpop.f32.mrf.mxu1 }
 0x27b   :  { %v1577_v25 = vadd.f32 %v2098_v24, %v3942_v27 }
 0x27c   :  { %v2100_v35 = vpop.f32.mrf.mxu0  ;;  %v1688_v36 = vpop.f32.mrf.mxu1 }
 0x27d   :  { %v3946_v39 = vadd.f32 %v1681_v58, %v1577_v25  ;;  %v2101_v40 = vadd.f32 %v2100_v35, %v2099_v32 }
 0x27f   :  { %v1728_v41 = vmin.f32 %v3946_v39, 20.0  ;;  %v1582_v42 = vadd.f32 %v2101_v40, %v3942_v27  ;;  %v2102_v23 = vpop.f32.mrf.mxu0  ;;  %v1691_v43 = vpop.f32.mrf.mxu1  ;;  %vm1720_vm6 = vcmp.gt.f32.partialorder %v3946_v39, 20.0 }
 0x281   :  { %v1736_v46 = vmul.f32 1.442695, %v1728_v41  ;;  %v3950_v47 = vadd.f32 %v1686_v34, %v1582_v42  ;;  %v2103_v0 = vpop.f32.mrf.mxu0  ;;  %v1693_v44 = vpop.f32.mrf.mxu1 }
 0x282   :  { %v2104_v45 = vadd.f32 %v2103_v0, %v2102_v23 }
 0x283   :  { %2153 = vpow2.f32 %v1736_v46  ;;  %v1729_v3 = vmin.f32 %v3950_v47, 20.0  ;;  %v2105_v51 = vpop.f32.mrf.mxu0  ;;  %v1696_v53 = vpop.f32.mrf.mxu1  ;;  %vm1721_vm7 = vcmp.gt.f32.partialorder %v3950_v47, 20.0 }
 0x284   :  { %v1587_v56 = vadd.f32 %v2104_v45, %v3942_v27 }
 0x285   :  { %v1738_v54 = vmul.f32 1.442695, %v1729_v3  ;;  %v2106_v57 = vpop.f32.mrf.mxu0  ;;  %v1698_v60 = vpop.f32.mrf.mxu1 }
 0x286   :  { %v3954_v62 = vadd.f32 %v1691_v43, %v1587_v56  ;;  %v2107_v50 = vadd.f32 %v2106_v57, %v2105_v51 }
 0x287   :  { %2155 = vpow2.f32 %v1738_v54  ;;  %v2108_v63 = vpop.f32.mrf.mxu0  ;;  %v1701_v52 = vpop.f32.mrf.mxu1 }
 0x288   :  { %v1730_v61 = vmin.f32 %v3954_v62, 20.0  ;;  %v1592_v33 = vadd.f32 %v2107_v50, %v3942_v27  ;;  %vm1722_vm8 = vcmp.gt.f32.partialorder %v3954_v62, 20.0 }
 0x289   :  { %v2109_v1 = vpop.f32.mrf.mxu0  ;;  %v1703_v2 = vpop.f32.mrf.mxu1 }
 0x28a   :  { %v1740_v4 = vmul.f32 1.442695, %v1730_v61  ;;  %v3958_v5 = vadd.f32 %v1696_v53, %v1592_v33  ;;  %v2110_v6 = vadd.f32 %v2109_v1, %v2108_v63 }
 0x28b   :  { %v2111_v7 = vpop.f32.mrf.mxu0  ;;  %v1706_v8 = vpop.f32.mrf.mxu1 }
 0x28c   :  { %2157 = vpow2.f32 %v1740_v4  ;;  %v1731_v9 = vmin.f32 %v3958_v5, 20.0  ;;  %v1597_v37 = vadd.f32 %v2110_v6, %v3942_v27  ;;  %vm1723_vm10 = vcmp.gt.f32.partialorder %v3958_v5, 20.0 }
 0x28d   :  { %v2112_v38 = vpop.f32.mrf.mxu0  ;;  %v1708_v10 = vpop.f32.mrf.mxu1 }
 0x28e   :  { %v1742_v11 = vmul.f32 1.442695, %v1731_v9  ;;  %v3962_v12 = vadd.f32 %v1701_v52, %v1597_v37  ;;  %v2113_v13 = vadd.f32 %v2112_v38, %v2111_v7 }
 0x28f   :  { %v2114_v55 = vpop.f32.mrf.mxu0  ;;  %v1711_v16 = vpop.f32.mrf.mxu1 }
 0x290   :  { %v2154_v14 = vpop.eup %2153  ;;  %2159 = vpow2.f32 %v1742_v11  ;;  %v1732_v59 = vmin.f32 %v3962_v12, 20.0  ;;  %v1602_v48 = vadd.f32 %v2113_v13, %v3942_v27  ;;  %vm1724_vm12 = vcmp.gt.f32.partialorder %v3962_v12, 20.0 }
 0x291   :  { %v2115_v18 = vpop.f32.mrf.mxu0  ;;  %v1713_v19 = vpop.f32.mrf.mxu1  ;;  %v1752_v20 = vadd.f32 1.0, %v2154_v14  ;;  %v1755_v3 = vmul.f32 -0.5, %v2154_v14  ;;  %v1758_v60 = vand.u32 2147483647, %v2154_v14 }
 0x292   :  { %v2116_v49 = vadd.f32 %v2115_v18, %v2114_v55  ;;  %v1744_v22 = vmul.f32 1.442695, %v1732_v59  ;;  %v3966_v15 = vadd.f32 %v1706_v8, %v1602_v48 }
 0x293   :  { %v2117_v17 = vpop.f32.mrf.mxu0  ;;  %v1716_v28 = vpop.f32.mrf.mxu1  ;;  %v1756_v56 = vadd.f32 1.0, %v1755_v3  ;;  %vm3983_vm3 = vcmp.lt.f32.partialorder %v1758_v60, 0.0004427343 }
 0x294   :  { %v2156_v21 = vpop.eup %2155  ;;  %2161 = vpow2.f32 %v1744_v22  ;;  %v1733_v58 = vmin.f32 %v3966_v15, 20.0  ;;  %v1607_v29 = vadd.f32 %v2116_v49, %v3942_v27  ;;  %vm1725_vm13 = vcmp.gt.f32.partialorder %v3966_v15, 20.0 }
 0x295   :  { %v1761_v26 = vadd.f32 1.0, %v2156_v21  ;;  %v2118_v31 = vpop.f32.mrf.mxu0  ;;  %v1718_v24 = vpop.f32.mrf.mxu1  ;;  %2163 = vlog2.f32 %v1752_v20  ;;  %v1764_v45 = vmul.f32 -0.5, %v2156_v21  ;;  %v1767_v61 = vand.u32 2147483647, %v2156_v21  ;;  %v499_v20 = vld [vmem:[%s4183_s6] sm:$0xff] }
 0x296   :  { %v2119_v32 = vadd.f32 %v2118_v31, %v2117_v17  ;;  %v1746_v34 = vmul.f32 1.442695, %v1733_v58  ;;  %v3970_v25 = vadd.f32 %v1711_v16, %v1607_v29  ;;  %v1757_v4 = vmul.f32 %v2154_v14, %v1756_v56  ;;  %v500_v17 = vld [vmem:[%s4183_s6 + $0x8] sm:$0xff] }
 0x297   :  { %2165 = vlog2.f32 %v1761_v26  ;;  %v1765_v50 = vadd.f32 1.0, %v1764_v45  ;;  %vm3991_vm5 = vcmp.lt.f32.partialorder %v1767_v61, 0.0004427343 }
 0x298   :  { %v1612_v35 = vadd.f32 %v2119_v32, %v3942_v27  ;;  %2167 = vpow2.f32 %v1746_v34  ;;  %v1734_v40 = vmin.f32 %v3970_v25, 20.0  ;;  %vm1726_vm15 = vcmp.gt.f32.partialorder %v3970_v25, 20.0 }
 0x299   :  { %v2158_v36 = vpop.eup %2157  ;;  %v1766_v9 = vmul.f32 %v2156_v21, %v1765_v50 }
 0x29a   :  { %v1770_v41 = vadd.f32 1.0, %v2158_v36  ;;  %v3974_v42 = vadd.f32 %v1716_v28, %v1612_v35  ;;  %v1748_v23 = vmul.f32 1.442695, %v1734_v40  ;;  %v1773_v57 = vmul.f32 -0.5, %v2158_v36 }
 0x29b   :  { %v1776_v37 = vand.u32 2147483647, %v2158_v36 }
 0x29c   :  { %2169 = vlog2.f32 %v1770_v41  ;;  %v1735_v46 = vmin.f32 %v3974_v42, 20.0  ;;  %v1774_v6 = vadd.f32 1.0, %v1773_v57  ;;  %vm1727_vm1 = vcmp.gt.f32.partialorder %v3974_v42, 20.0 }
 0x29d   :  { %v2160_v43 = vpop.eup %2159  ;;  %2171 = vpow2.f32 %v1748_v23  ;;  %vm4008_vm9 = vcmp.lt.f32.partialorder %v1776_v37, 0.0004427343 }
 0x29e   :  { %v1779_v0 = vadd.f32 1.0, %v2160_v43  ;;  %v1750_v44 = vmul.f32 1.442695, %v1735_v46  ;;  %v1782_v1 = vmul.f32 -0.5, %v2160_v43  ;;  %v1775_v48 = vmul.f32 %v2158_v36, %v1774_v6  ;;  %v501_v36 = vld [vmem:[%s4183_s6 + $0x10] sm:$0xff] }
 0x29f   :  { %v1785_v18 = vand.u32 2147483647, %v2160_v43 }
 0x2a0   :  { %2173 = vlog2.f32 %v1779_v0  ;;  %v1783_v55 = vadd.f32 1.0, %v1782_v1 }
 0x2a1   :  { %2175 = vpow2.f32 %v1750_v44  ;;  %v3977_v27 = vpop.eup %2161  ;;  %vm4026_vm11 = vcmp.lt.f32.partialorder %v1785_v18, 0.0004427343 }
 0x2a2   :  { %v2164_v51 = vpop.eup %2163  ;;  %v1788_v53 = vadd.f32 1.0, %v3977_v27  ;;  %v1791_v16 = vmul.f32 -0.5, %v3977_v27  ;;  %v1784_v58 = vmul.f32 %v2160_v43, %v1783_v55 }
 0x2a3   :  { %v1754_v52 = vmul.f32 0.6931472, %v2164_v51 }
 0x2a4   :  { %v2166_v54 = vpop.eup %2165  ;;  %2177 = vlog2.f32 %v1788_v53  ;;  %v1792_v29 = vadd.f32 1.0, %v1791_v16  ;;  %v502_v53 = vld [vmem:[%s4183_s6 + $0x18] sm:$0xff] }
 0x2a5   :  { %v3980_v63 = vpop.eup %2167  ;;  %v1763_v33 = vmul.f32 0.6931472, %v2166_v54  ;;  %v1760_v10 = vsel %vm3983_vm3, %v1757_v4, %v1754_v52 }
 0x2a6   :  { %v1797_v2 = vadd.f32 1.0, %v3980_v63  ;;  %v4005_v49 = vsel %vm1720_vm6, %v3946_v39, %v1760_v10  ;;  %v1800_v31 = vmul.f32 -0.5, %v3980_v63  ;;  %v1793_v3 = vmul.f32 %v3977_v27, %v1792_v29  ;;  %v504_v10 = vld [vmem:[%s4183_s6 + $0x28] sm:$0xff] }
 0x2a7   :  { %v1769_v14 = vsel %vm3991_vm5, %v1766_v9, %v1763_v33  ;;  %v1955_v32 = vmul.f32 %v4005_v49, %v499_v20  ;;  %v4045_v43 = vsel %vm1832_vm4, %v4005_v49, -inf  ;;  %v1984_v46 = vsel %vm1832_vm4, %v4005_v49, 0.0 }
 0x2a8   :  { %2179 = vlog2.f32 %v1797_v2  ;;  %v4018_v28 = vsel %vm1721_vm7, %v3950_v47, %v1769_v14  ;;  %v1794_v47 = vand.u32 2147483647, %v3977_v27  ;;  %v1801_v45 = vadd.f32 1.0, %v1800_v31 }
 0x2a9   :  { %v2170_v7 = vpop.eup %2169  ;;  %v1956_v35 = vmul.f32 %v4018_v28, %v500_v17  ;;  %v1803_v56 = vand.u32 2147483647, %v3980_v63  ;;  %v1963_v57 = vsel %vm1832_vm4, %v1955_v32, 0.0  ;;  %v4070_v61 = vsel %vm1832_vm4, %v4018_v28, -inf }
 0x2aa   :  { %v3987_v38 = vpop.eup %2171  ;;  %v1772_v13 = vmul.f32 0.6931472, %v2170_v7  ;;  %vm1795_vm14 = vcmp.lt.f32.partialorder %v1794_v47, 0.0004427343  ;;  %v1802_v8 = vmul.f32 %v3980_v63, %v1801_v45  ;;  %vm2016_vm5 = vcmask 0  }
 0x2ab   :  { %v1806_v59 = vadd.f32 1.0, %v3987_v38  ;;  %v1809_v0 = vmul.f32 -0.5, %v3987_v38  ;;  %v1964_v60 = vsel %vm1832_vm4, %v1956_v35, 0.0  ;;  %vm1804_vm0 = vcmp.lt.f32.partialorder %v1803_v56, 0.0004427343 }
 0x2ac   :  { %v1778_v39 = vsel %vm4008_vm9, %v1775_v48, %v1772_v13  ;;  %v1965_v9 = vadd.f32 %v1964_v60, %v1963_v57  ;;  %vm1878_vm6 = vcmask 523264  }
 0x2ad   :  { %v2174_v19 = vpop.eup %2173  ;;  %2181 = vlog2.f32 %v1806_v59  ;;  %v4039_v40 = vsel %vm1722_vm8, %v3954_v62, %v1778_v39  ;;  %v1985_v62 = vsel %vm1832_vm4, %v4018_v28, 0.0  ;;  %v1810_v2 = vadd.f32 1.0, %v1809_v0 }
 0x2ae   :  { %v4012_v22 = vpop.eup %2175  ;;  %v1781_v26 = vmul.f32 0.6931472, %v2174_v19  ;;  %v1957_v51 = vmul.f32 %v4039_v40, %v501_v36  ;;  %v1986_v33 = vadd.f32 %v1985_v62, %v1984_v46  ;;  %v1987_v4 = vsel %vm1832_vm4, %v4039_v40, 0.0 }
 0x2af   :  { %v1815_v24 = vadd.f32 1.0, %v4012_v22  ;;  %v1818_v50 = vmul.f32 -0.5, %v4012_v22  ;;  %v1835_v16 = vsel %vm1832_vm4, %v4039_v40, -inf  ;;  %v1811_v18 = vmul.f32 %v3987_v38, %v1810_v2 }
 0x2b0   :  { %v1787_v41 = vsel %vm4026_vm11, %v1784_v58, %v1781_v26  ;;  %v1966_v37 = vsel %vm1832_vm4, %v1957_v51, 0.0  ;;  %v1988_v59 = vadd.f32 %v1987_v4, %v1986_v33  ;;  %v505_v58 = vld [vmem:[%s4183_s6 + $0x30] sm:$0xff] }
 0x2b1   :  { %2183 = vlog2.f32 %v1815_v24  ;;  %v2178_v23 = vpop.eup %2177  ;;  %v4061_v54 = vsel %vm1723_vm10, %v3958_v5, %v1787_v41  ;;  %v503_v5 = vld [vmem:[%s4183_s6 + $0x20] sm:$0xff]  ;;  %v1819_v55 = vadd.f32 1.0, %v1818_v50  ;;  %v1967_v39 = vadd.f32 %v1966_v37, %v1965_v9 }
 0x2b2   :  { %v1790_v44 = vmul.f32 0.6931472, %v2178_v23  ;;  %v1958_v6 = vmul.f32 %v4061_v54, %v502_v53  ;;  %v1989_v11 = vsel %vm1832_vm4, %v4061_v54, 0.0  ;;  %v1836_v45 = vsel %vm1832_vm4, %v4061_v54, -inf }
 0x2b3   :  { %v1990_v26 = vadd.f32 %v1989_v11, %v1988_v59  ;;  %v1820_v24 = vmul.f32 %v4012_v22, %v1819_v55 }
 0x2b4   :  { %v1796_v27 = vsel %vm1795_vm14, %v1793_v3, %v1790_v44  ;;  %v1968_v19 = vsel %vm1832_vm4, %v1958_v6, 0.0  ;;  %v506_v3 = vld [vmem:[%s4183_s6 + $0x38] sm:$0xff] }
 0x2b5   :  { %v2180_v52 = vpop.eup %2179  ;;  %v4078_v1 = vsel %vm1724_vm12, %v3962_v12, %v1796_v27  ;;  %v1812_v12 = vand.u32 2147483647, %v3987_v38  ;;  %v1969_v34 = vadd.f32 %v1968_v19, %v1967_v39 }
 0x2b6   :  { %v1799_v7 = vmul.f32 0.6931472, %v2180_v52  ;;  %v1959_v13 = vmul.f32 %v4078_v1, %v503_v5  ;;  %v1991_v20 = vsel %vm1832_vm4, %v4078_v1, 0.0  ;;  %v1837_v62 = vsel %vm1832_vm4, %v4078_v1, -inf }
 0x2b7   :  { %vm1813_vm2 = vcmp.lt.f32.partialorder %v1812_v12, 0.0004427343  ;;  %v1992_v47 = vadd.f32 %v1991_v20, %v1990_v26  ;;  %v1838_v50 = vmax.f32 %v4045_v43, %v1837_v62 }
 0x2b8   :  { %v1805_v14 = vsel %vm1804_vm0, %v1802_v8, %v1799_v7  ;;  %v1970_v29 = vsel %vm1832_vm4, %v1959_v13, 0.0 }
 0x2b9   :  { %v4098_v48 = vsel %vm1725_vm13, %v3966_v15, %v1805_v14  ;;  %v1821_v15 = vand.u32 2147483647, %v4012_v22  ;;  %v1971_v22 = vadd.f32 %v1970_v29, %v1969_v34 }
 0x2ba   :  { %v2182_v63 = vpop.eup %2181  ;;  %v1960_v21 = vmul.f32 %v4098_v48, %v504_v10  ;;  %v1993_v38 = vsel %vm1832_vm4, %v4098_v48, 0.0  ;;  %v1839_v35 = vsel %vm1832_vm4, %v4098_v48, -inf }
 0x2bb   :  { %v1808_v17 = vmul.f32 0.6931472, %v2182_v63  ;;  %v1994_v44 = vadd.f32 %v1993_v38, %v1992_v47  ;;  %vm1822_vm3 = vcmp.lt.f32.partialorder %v1821_v15, 0.0004427343  ;;  %v1840_v56 = vmax.f32 %v4070_v61, %v1839_v35 }
 0x2bc   :  { %v1972_v41 = vsel %vm1832_vm4, %v1960_v21, 0.0 }
 0x2bd   :  { %v1814_v31 = vsel %vm1813_vm2, %v1811_v18, %v1808_v17  ;;  %v1973_v27 = vadd.f32 %v1972_v41, %v1971_v22  ;;  %v1845_v61 = vmax.f32 %v1838_v50, %v1840_v56 }
 0x2be   :  { %v2184_v32 = vpop.eup %2183  ;;  %v1830_v36 = vsel %vm1726_vm15, %v3970_v25, %v1814_v31 }
 0x2bf   :  { %v1961_v23 = vmul.f32 %v1830_v36, %v505_v58  ;;  %v1995_v46 = vsel %vm1832_vm4, %v1830_v36, 0.0  ;;  %v1817_v0 = vmul.f32 0.6931472, %v2184_v32  ;;  %v1841_v25 = vsel %vm1832_vm4, %v1830_v36, -inf }
 0x2c0   :  { %v1996_v57 = vadd.f32 %v1995_v46, %v1994_v44  ;;  %v1842_v2 = vmax.f32 %v1835_v16, %v1841_v25 }
 0x2c1   :  { %v1823_v51 = vsel %vm1822_vm3, %v1820_v24, %v1817_v0  ;;  %v1974_v53 = vsel %vm1832_vm4, %v1961_v23, 0.0 }
 0x2c2   :  { %v1831_v60 = vsel %vm1727_vm1, %v3974_v42, %v1823_v51  ;;  %v1975_v6 = vadd.f32 %v1974_v53, %v1973_v27  ;;  %v498_v51 = vld [vmem:[%s4182_s5] sm:$0xff] }
 0x2c3   :  { %v1843_v52 = vsel %vm1832_vm4, %v1831_v60, -inf  ;;  %v1962_v33 = vmul.f32 %v1831_v60, %v506_v3  ;;  %v1997_v5 = vsel %vm1832_vm4, %v1831_v60, 0.0 }
 0x2c4   :  { %v1844_v4 = vmax.f32 %v1836_v45, %v1843_v52  ;;  %v1998_v7 = vadd.f32 %v1997_v5, %v1996_v57 }
 0x2c5   :  { %v1976_v8 = vsel %vm1832_vm4, %v1962_v33, 0.0 }
 0x2c6   :  { %v1846_v9 = vmax.f32 %v1842_v2, %v1844_v4  ;;  %v1977_v37 = vadd.f32 %v1976_v8, %v1975_v6  ;;  %v1999_v10 = vrot.slane %v1998_v7, 4 }
 0x2c8   :  { %v1847_v12 = vmax.f32 %v1845_v61, %v1846_v9  ;;  %v1978_v42 = vrot.slane %v1977_v37, 4  ;;  %v2000_v11 = vadd.f32 %v1999_v10, %v1998_v7 }
 0x2ca   :  { %v1848_v13 = vrot.slane %v1847_v12, 4  ;;  %v1979_v43 = vadd.f32 %v1978_v42, %v1977_v37  ;;  %v2001_v14 = vrot.slane %v2000_v11, 2 }
 0x2cc   :  { %v1849_v55 = vmax.f32 %v1847_v12, %v1848_v13  ;;  %v1980_v63 = vrot.slane %v1979_v43, 2  ;;  %v2002_v59 = vadd.f32 %v2001_v14, %v2000_v11 }
 0x2ce   :  { %v1850_v18 = vrot.slane %v1849_v55, 2  ;;  %v1981_v16 = vadd.f32 %v1980_v63, %v1979_v43  ;;  %v2003_v19 = vrot.slane %v2002_v59, 1 }
 0x2d0   :  { %v1851_v20 = vmax.f32 %v1849_v55, %v1850_v18  ;;  %v1982_v21 = vrot.slane %v1981_v16, 1  ;;  %v2004_v26 = vadd.f32 %v2003_v19, %v2002_v59 }
 0x2d2   :  { %v1852_v17 = vrot.slane %v1851_v20, 1  ;;  %v1983_v39 = vadd.f32 %v1982_v21, %v1981_v16  ;;  %v2018_v24 = vmul.f32 0.015625, %v2004_v26 }
 0x2d4   :  { %v4137_v58 = vmax.f32 %v1851_v20, %v1852_v17  ;;  %v4139_v15 = vmul.f32 0.125, %v1983_v39 }
 0x2d6   :  { %v1861_v29 = vsub.f32 %v1831_v60, %v4137_v58  ;;  %v1860_v38 = vsub.f32 %v1830_v36, %v4137_v58  ;;  %v1859_v31 = vsub.f32 %v4098_v48, %v4137_v58  ;;  %v1858_v47 = vsub.f32 %v4078_v1, %v4137_v58 }
 0x2d7   :  { %v2019_v35 = vsub.f32 %v4139_v15, %v2018_v24  ;;  %v1857_v23 = vsub.f32 %v4061_v54, %v4137_v58  ;;  %v1856_v48 = vsub.f32 %v4039_v40, %v4137_v58  ;;  %v1855_v0 = vsub.f32 %v4018_v28, %v4137_v58 }
 0x2d8   :  { %v1876_v32 = vmul.f32 1.442695, %v1861_v29  ;;  %v1874_v34 = vmul.f32 1.442695, %v1860_v38  ;;  %v1872_v41 = vmul.f32 1.442695, %v1859_v31  ;;  %v1854_v62 = vsub.f32 %v4005_v49, %v4137_v58 }
 0x2d9   :  { %2020 = vst.msk [vmem:[#allocation5] sm:$0x1] %vm2016_vm5, %v2019_v35  ;;  %v1870_v36 = vmul.f32 1.442695, %v1858_v47  ;;  %v1868_v46 = vmul.f32 1.442695, %v1857_v23 }
 0x2da   :  { %2185 = vpow2.f32 %v1876_v32  ;;  %v1866_v1 = vmul.f32 1.442695, %v1856_v48  ;;  %v1864_v22 = vmul.f32 1.442695, %v1855_v0  ;;  %v1862_v54 = vmul.f32 1.442695, %v1854_v62 }
 0x2db   :  { %2187 = vpow2.f32 %v1874_v34 }
 0x2dc   :  { %2189 = vpow2.f32 %v1872_v41 }
 0x2dd   :  { %2191 = vpow2.f32 %v1870_v36 }
 0x2de   :  { %2193 = vpow2.f32 %v1868_v46 }
 0x2df   :  { %2195 = vpow2.f32 %v1866_v1 }
 0x2e0   :  { %2197 = vpow2.f32 %v1864_v22 }
 0x2e1   :  { %2199 = vpow2.f32 %v1862_v54 }
 0x2e7   :  { %v2186_v44 = vpop.eup %2185 }
 0x2e8   :  { %2130 = vmatpush3.msra.mxu0 %v2186_v44  ;;  %v2188_v3 = vpop.eup %2187 }
 0x2e9   :  { %2131 = vmatprep.subr.mxu0 %v2254_v30  ;;  %v2190_v40 = vpop.eup %2189 }
 0x2ea   :  { %2132 = vmatpush3.msra.mxu0 %v2188_v3  ;;  %v2192_v28 = vpop.eup %2191 }
 0x2eb   :  { %2133 = vmatprep.subr.mxu0 %v2254_v30  ;;  %v2194_v49 = vpop.eup %2193 }
 0x2ec   :  { %2134 = vmatpush3.msra.mxu0 %v2190_v40  ;;  %v2196_v45 = vpop.eup %2195 }
 0x2ed   :  { %2135 = vmatprep.subr.mxu0 %v2254_v30  ;;  %v2198_v25 = vpop.eup %2197 }
 0x2ee   :  { %2136 = vmatpush3.msra.mxu0 %v2192_v28  ;;  %v2200_v53 = vpop.eup %2199 }
 0x2ef   :  { %2137 = vmatprep.subr.mxu0 %v2254_v30 }
 0x2f0   :  { %2138 = vmatpush3.msra.mxu0 %v2194_v49 }
 0x2f1   :  { %2139 = vmatprep.subr.mxu0 %v2254_v30 }
 0x2f2   :  { %2140 = vmatpush3.msra.mxu0 %v2196_v45 }
 0x2f3   :  { %2141 = vmatprep.subr.mxu0 %v2254_v30 }
 0x2f4   :  { %2142 = vmatpush3.msra.mxu0 %v2198_v25 }
 0x2f5   :  { %2143 = vmatprep.subr.mxu0 %v2254_v30 }
 0x2f6   :  { %2144 = vmatpush3.msra.mxu0 %v2200_v53 }
 0x2f7   :  { %2146 = vmatmul.mubr.msk.f32.vlgmr.msra.gmra.mxu0 %vm1878_vm6, %v498_v51 }
 0x2f8   :  { %2221 = shalt.err (!%p2218_p4)
}
 0x2f9   :  { %2040 = dma.vmem_to_hbm [thread:$0]  %s2038_s14, 16, %s4185_s8, [#allocation6]  }
 0x2fa   :  { %s2258_s5 = smov [#allocation3]  }
 0x2fb   :  { %s2027_s18 = sshll.u32 %s2258_s5, 4  ;;  %s2028_s18 = int_to_ptr.vmem [resolvable:$true] %s2027_s18 }
 0x2fc   :  { %s2230_s8 = scalar_lea.vmem %s2028_s18, 16  ;;  %s2234_s19 = scalar_lea.vmem %s2028_s18, 32 }
 0x2fd   :  { %p2231_p5 = scmp.ne.s32.totalorder %s2028_s18, %s2230_s8  ;;  %p2235_p6 = scmp.lt.s32.totalorder %s2028_s18, %s2028_s18 }
 0x2fe   :  { %p2236_p7 = scmp.lt.s32.totalorder %s2234_s19, %s2230_s8 }
 0x300   :  { %p2237_p8 = por %p2236_p7, %p2235_p6 }
 0x302   :  { %p2238_p9 = pnand %p2237_p8, %p2231_p5 }
 0x3b7   :  { %v1948_v56 = vpop.f32.mrf.mxu0 }
 0x3b8   :  { %2201 = vlog2.f32 %v1948_v56 }
 0x3b9   :  { %v2147_v30 = vpop.f32.mrf.mxu0 }
 0x3c5   :  { %v2202_v57 = vpop.eup %2201 }
 0x3c6   :  { %v1953_v60 = vmul.f32 0.6931472, %v2202_v57 }
 0x3c8   :  { %v1954_v27 = vadd.f32 %v1953_v60, %v4137_v58 }
 0x3ca   :  { %v2005_v50 = vsel %vm1832_vm4, %v1954_v27, 0.0 }
 0x3cb   :  { %v2006_v52 = vrot.slane %v2005_v50, 4 }
 0x3cd   :  { %v2007_v33 = vadd.f32 %v2006_v52, %v2005_v50 }
 0x3cf   :  { %v2008_v5 = vrot.slane %v2007_v33, 2 }
 0x3d1   :  { %v2009_v2 = vadd.f32 %v2008_v5, %v2007_v33 }
 0x3d3   :  { %v2010_v4 = vrot.slane %v2009_v2, 1 }
 0x3d5   :  { %v2011_v6 = vadd.f32 %v2010_v4, %v2009_v2 }
 0x3d7   :  { %v2013_v7 = vmul.f32 0.125, %v2011_v6 }
 0x3d9   :  { %v2063_v8 = vadd.f32 -2.0794415, %v2013_v7 }
 0x3db   :  { %v2015_v61 = vsub.f32 %v4139_v15, %v2063_v8 }
 0x3dd   :  { %2017 = vst.msk [vmem:[#allocation3] sm:$0x1] %vm2016_vm5, %v2015_v61 }
 0x3de   :  { %2241 = shalt.err (!%p2238_p9)
}
 0x3df   :  { %2030 = dma.vmem_to_hbm [thread:$0]  %s2028_s18, 16, %s4184_s7, [#allocation4]  }
 0x3e0   :  { %2250 = dma.done.wait [#allocation4], 16  }
 0x3e1   :  { %2251 = vsyncadd [#allocation4], 4294967280 }
 0x3e2   :  { %2252 = dma.done.wait [#allocation6], 16  }
 0x3e3   :  { %2253 = vsyncadd [#allocation6], 4294967280 }
 0x3e4   :  { %2047 = vsyncpa [#allocation4], 1 }
 0x3e5   :  { %2048 = vsyncpa [#allocation6], 1 }

</bundles_post_ra>
